<compile_context>
chip_gen: v5e
topology: v5e:2x2
jax: 0.10.0
libtpu: 0.0.40
codegen_flags: <defaults>
</compile_context>

<pallas_src>
import functools

import jax
import jax.numpy as jnp
import numpy as np
from jax.experimental import pallas as pl
from jax.experimental.pallas import tpu as pltpu


# ---------------------------------------------------------------------------
# Fused Pallas kernel: lin_in -> rgcn1 -> rgcn2 -> rgcn3 -> lin_hid -> lin_out
# ---------------------------------------------------------------------------

def _fused_rgcn_kernel(
    feat_ref, adj_ref,
    w_in_ref, b_in_ref,
    w1_ref, r1_ref, b1_ref,
    w2_ref, r2_ref, b2_ref,
    w3_ref, r3_ref, b3_ref,
    w_hid_ref, b_hid_ref,
    w_out_ref, b_out_ref,
    o_ref,
    x_scratch, h_scratch,
    *, num_relations, slope,
):
    f32 = jnp.float32
    n_nodes = x_scratch.shape[0]

    # ---- input linear + LeakyReLU (K = emb_dim) ----------------------------------
    y = jnp.dot(feat_ref[...], w_in_ref[...], preferred_element_type=f32) + b_in_ref[...]
    y = jnp.where(y >= 0, y, slope * y)
    x_scratch[...] = y.astype(x_scratch.dtype)

    adj = adj_ref[...]  # (N, R*N) bf16, per-relation row-normalized (mean aggregation)

    # ---- one RGCN layer: out = x@W_root + b + A_cat @ stack_r(x@W_r) -------------
    def rgcn(w_ref, root_ref, b_ref):
        x = x_scratch[...]                                               # (N, H) bf16
        out = jnp.dot(x, root_ref[...], preferred_element_type=f32) + b_ref[...]
        for r in range(num_relations):                                    # static, small
            h_scratch[pl.ds(r * n_nodes, n_nodes), :] = (
                jnp.dot(x, w_ref[r], preferred_element_type=f32)
                .astype(h_scratch.dtype))
        # single aggregation matmul, K = R*N (fills the 256-wide MXU on v6e/v7x)
        out = out + jnp.dot(adj, h_scratch[...], preferred_element_type=f32)
        x_scratch[...] = out.astype(x_scratch.dtype)

    rgcn(w1_ref, r1_ref, b1_ref)
    # F.dropout(..., training=False) -> identity
    rgcn(w2_ref, r2_ref, b2_ref)
    rgcn(w3_ref, r3_ref, b3_ref)

    # ---- hidden linear + LeakyReLU, then lane-padded output linear ----------------
    x = x_scratch[...]
    y = jnp.dot(x, w_hid_ref[...], preferred_element_type=f32) + b_hid_ref[...]
    y = jnp.where(y >= 0, y, slope * y)
    out = jnp.dot(y.astype(x_scratch.dtype), w_out_ref[...],
                  preferred_element_type=f32) + b_out_ref[...]
    o_ref[...] = out.astype(o_ref.dtype)   # (N, 128) lane-dense unmasked store


# ---------------------------------------------------------------------------
# Glue (plain JAX): dense normalized adjacency + parameter init + forward
# ---------------------------------------------------------------------------

def build_adj_2d(edge_index, edge_type, num_nodes, num_relations):
    """A_r[i, j] = (#edges j->i of type r) / in_deg_r(i), concatenated to (N_dst, R*N_src)."""
    src, dst = edge_index[0], edge_index[1]
    adj = jnp.zeros((num_relations, num_nodes, num_nodes), jnp.float32)
    adj = adj.at[edge_type, dst, src].add(1.0)
    deg = adj.sum(axis=2, keepdims=True)
    adj = adj / jnp.maximum(deg, 1.0)              # f32 normalization; isolated nodes stay 0
    adj2d = jnp.transpose(adj, (1, 0, 2)).reshape(num_nodes, num_relations * num_nodes)
    return adj2d.astype(jnp.bfloat16)              # bf16 stream, f32 accumulation in-kernel


def init_params(key, emb_dim, hidden, out_dim, num_relations, out_pad=128):
    ks = jax.random.split(key, 9)
    s = 0.1
    wdt = jnp.bfloat16
    p = {
        "lin_in_w": (jax.random.normal(ks[0], (emb_dim, hidden), jnp.float32) * s).astype(wdt),
        "lin_in_b": jax.random.normal(ks[1], (1, hidden), jnp.float32) * s,
        "lin_hid_w": (jax.random.normal(ks[2], (hidden, hidden), jnp.float32) * s).astype(wdt),
        "lin_hid_b": jax.random.normal(ks[3], (1, hidden), jnp.float32) * s,
    }
    w_out = jax.random.normal(ks[4], (hidden, out_dim), jnp.float32) * s
    b_out = jax.random.normal(ks[5], (1, out_dim), jnp.float32) * s
    # lane-pad the 3-wide output projection to 128 zero-filled columns
    p["lin_out_w"] = (jnp.zeros((hidden, out_pad), jnp.float32)
                      .at[:, :out_dim].set(w_out).astype(wdt))
    p["lin_out_b"] = jnp.zeros((1, out_pad), jnp.float32).at[:, :out_dim].set(b_out)
    for li, layer in enumerate(["rgcn1", "rgcn2", "rgcn3"]):
        kw, kr, kb = jax.random.split(ks[6 + li], 3)
        p[f"{layer}_w"] = (jax.random.normal(kw, (num_relations, hidden, hidden), jnp.float32)
                           * s).astype(wdt)
        p[f"{layer}_root"] = (jax.random.normal(kr, (hidden, hidden), jnp.float32) * s).astype(wdt)
        p[f"{layer}_b"] = jax.random.normal(kb, (1, hidden), jnp.float32) * s
    return p


def complex_rgcn_forward(params, feature, edge_index, edge_type, *, num_relations, out_dim):
    num_nodes, emb_dim = feature.shape
    hidden = params["lin_in_w"].shape[1]
    out_pad = params["lin_out_w"].shape[1]

    adj = build_adj_2d(edge_index, edge_type, num_nodes, num_relations)   # (N, R*N) bf16
    feat = feature.astype(jnp.float32)

    def full(*shape):
        return pl.BlockSpec(shape, lambda i, _n=len(shape): (0,) * _n)

    kernel = functools.partial(_fused_rgcn_kernel, num_relations=num_relations, slope=0.01)

    out_padded = pl.pallas_call(
        kernel,
        out_shape=jax.ShapeDtypeStruct((num_nodes, out_pad), jnp.float32),
        grid=(1,),
        in_specs=[
            full(num_nodes, emb_dim),
            full(num_nodes, num_relations * num_nodes),
            full(emb_dim, hidden), full(1, hidden),
            full(num_relations, hidden, hidden), full(hidden, hidden), full(1, hidden),
            full(num_relations, hidden, hidden), full(hidden, hidden), full(1, hidden),
            full(num_relations, hidden, hidden), full(hidden, hidden), full(1, hidden),
            full(hidden, hidden), full(1, hidden),
            full(hidden, out_pad), full(1, out_pad),
        ],
        out_specs=full(num_nodes, out_pad),
        scratch_shapes=[
            pltpu.VMEM((num_nodes, hidden), jnp.bfloat16),                   # resident x
            pltpu.VMEM((num_relations * num_nodes, hidden), jnp.bfloat16),   # stacked h_r
        ],
        compiler_params=pltpu.CompilerParams(dimension_semantics=("arbitrary",)),
    )(
        feat, adj,
        params["lin_in_w"], params["lin_in_b"],
        params["rgcn1_w"], params["rgcn1_root"], params["rgcn1_b"],
        params["rgcn2_w"], params["rgcn2_root"], params["rgcn2_b"],
        params["rgcn3_w"], params["rgcn3_root"], params["rgcn3_b"],
        params["lin_hid_w"], params["lin_hid_b"],
        params["lin_out_w"], params["lin_out_b"],
    )
    return out_padded[:, :out_dim]


# ---------------------------------------------------------------------------
# Plain-JAX reference (f32) for a loose numerical sanity check
# ---------------------------------------------------------------------------

def reference_forward(params, feature, edge_index, edge_type, *, num_relations, out_dim):
    num_nodes = feature.shape[0]
    adj2d = build_adj_2d(edge_index, edge_type, num_nodes, num_relations).astype(jnp.float32)
    adj = adj2d.reshape(num_nodes, num_relations, num_nodes).transpose(1, 0, 2)

    def leaky(v):
        return jnp.where(v >= 0, v, 0.01 * v)

    f32 = lambda a: a.astype(jnp.float32)
    x = leaky(feature.astype(jnp.float32) @ f32(params["lin_in_w"]) + params["lin_in_b"])
    for layer in ["rgcn1", "rgcn2", "rgcn3"]:
        out = x @ f32(params[f"{layer}_root"]) + params[f"{layer}_b"]
        w = f32(params[f"{layer}_w"])
        for r in range(num_relations):
            out = out + adj[r] @ (x @ w[r])
        x = out
    x = leaky(x @ f32(params["lin_hid_w"]) + params["lin_hid_b"])
    x = x @ f32(params["lin_out_w"]) + params["lin_out_b"]
    return x[:, :out_dim]


# ---------------------------------------------------------------------------
# Demo
# ---------------------------------------------------------------------------

if __name__ == "__main__":
    EMB_DIM = 16
    HIDDEN = 128
    OUT_DIM = 3
    NUM_REL = 2
    NUM_NODES = 128
    NUM_EDGES = 512

    key = jax.random.PRNGKey(0)
    k_feat, k_src, k_dst, k_type, k_params = jax.random.split(key, 5)

    feature = jax.random.normal(k_feat, (NUM_NODES, EMB_DIM), jnp.float32)
    edge_index = jnp.stack(
        [
            jax.random.randint(k_src, (NUM_EDGES,), 0, NUM_NODES),
            jax.random.randint(k_dst, (NUM_EDGES,), 0, NUM_NODES),
        ],
        axis=0,
    ).astype(jnp.int32)
    edge_type = jax.random.randint(k_type, (NUM_EDGES,), 0, NUM_REL).astype(jnp.int32)

    params = init_params(k_params, EMB_DIM, HIDDEN, OUT_DIM, NUM_REL)

    fwd = jax.jit(functools.partial(complex_rgcn_forward,
                                    num_relations=NUM_REL, out_dim=OUT_DIM))
    out = fwd(params, feature, edge_index, edge_type)
    jax.block_until_ready(out)

    assert out.shape == (NUM_NODES, OUT_DIM), out.shape
    assert out.dtype == jnp.float32
    assert bool(jnp.all(jnp.isfinite(out)))

    ref = reference_forward(params, feature, edge_index, edge_type,
                            num_relations=NUM_REL, out_dim=OUT_DIM)
    max_err = float(jnp.max(jnp.abs(out - ref)))
    assert np.allclose(np.asarray(out), np.asarray(ref), rtol=2e-1, atol=2e-1), max_err

    print("KERNEL_OK")
</pallas_src>

<mosaic_0001>
module attributes {stable_mosaic.version = 11 : i64} {
  func.func @_fused_rgcn_kernel(%arg0: i32, %arg1: memref<128x16xf32, #tpu.memory_space<vmem>>, %arg2: memref<128x256xbf16, #tpu.memory_space<vmem>>, %arg3: memref<16x128xbf16, #tpu.memory_space<vmem>>, %arg4: memref<1x128xf32, #tpu.memory_space<vmem>>, %arg5: memref<2x128x128xbf16, #tpu.memory_space<vmem>>, %arg6: memref<128x128xbf16, #tpu.memory_space<vmem>>, %arg7: memref<1x128xf32, #tpu.memory_space<vmem>>, %arg8: memref<2x128x128xbf16, #tpu.memory_space<vmem>>, %arg9: memref<128x128xbf16, #tpu.memory_space<vmem>>, %arg10: memref<1x128xf32, #tpu.memory_space<vmem>>, %arg11: memref<2x128x128xbf16, #tpu.memory_space<vmem>>, %arg12: memref<128x128xbf16, #tpu.memory_space<vmem>>, %arg13: memref<1x128xf32, #tpu.memory_space<vmem>>, %arg14: memref<128x128xbf16, #tpu.memory_space<vmem>>, %arg15: memref<1x128xf32, #tpu.memory_space<vmem>>, %arg16: memref<128x128xbf16, #tpu.memory_space<vmem>>, %arg17: memref<1x128xf32, #tpu.memory_space<vmem>>, %arg18: memref<128x128xf32, #tpu.memory_space<vmem>>, %arg19: memref<128x128xbf16, #tpu.memory_space<vmem>>, %arg20: memref<256x128xbf16, #tpu.memory_space<vmem>>) attributes {dimension_semantics = [#tpu.dimension_semantics<arbitrary>], iteration_bounds = array<i64: 1>, scalar_prefetch = 0 : i64, scratch_operands = 2 : i64, tpu.core_type = #tpu.core_type<tc>, window_params = [{pipeline_mode = #tpu.pipeline_mode<synchronous>, transform_indices = @transform_0, window_bounds = array<i64: 128, 16>}, {pipeline_mode = #tpu.pipeline_mode<synchronous>, transform_indices = @transform_1, window_bounds = array<i64: 128, 256>}, {pipeline_mode = #tpu.pipeline_mode<synchronous>, transform_indices = @transform_2, window_bounds = array<i64: 16, 128>}, {pipeline_mode = #tpu.pipeline_mode<synchronous>, transform_indices = @transform_3, window_bounds = array<i64: 1, 128>}, {pipeline_mode = #tpu.pipeline_mode<synchronous>, transform_indices = @transform_4, window_bounds = array<i64: 2, 128, 128>}, {pipeline_mode = #tpu.pipeline_mode<synchronous>, transform_indices = @transform_5, window_bounds = array<i64: 128, 128>}, {pipeline_mode = #tpu.pipeline_mode<synchronous>, transform_indices = @transform_6, window_bounds = array<i64: 1, 128>}, {pipeline_mode = #tpu.pipeline_mode<synchronous>, transform_indices = @transform_7, window_bounds = array<i64: 2, 128, 128>}, {pipeline_mode = #tpu.pipeline_mode<synchronous>, transform_indices = @transform_8, window_bounds = array<i64: 128, 128>}, {pipeline_mode = #tpu.pipeline_mode<synchronous>, transform_indices = @transform_9, window_bounds = array<i64: 1, 128>}, {pipeline_mode = #tpu.pipeline_mode<synchronous>, transform_indices = @transform_10, window_bounds = array<i64: 2, 128, 128>}, {pipeline_mode = #tpu.pipeline_mode<synchronous>, transform_indices = @transform_11, window_bounds = array<i64: 128, 128>}, {pipeline_mode = #tpu.pipeline_mode<synchronous>, transform_indices = @transform_12, window_bounds = array<i64: 1, 128>}, {pipeline_mode = #tpu.pipeline_mode<synchronous>, transform_indices = @transform_13, window_bounds = array<i64: 128, 128>}, {pipeline_mode = #tpu.pipeline_mode<synchronous>, transform_indices = @transform_14, window_bounds = array<i64: 1, 128>}, {pipeline_mode = #tpu.pipeline_mode<synchronous>, transform_indices = @transform_15, window_bounds = array<i64: 128, 128>}, {pipeline_mode = #tpu.pipeline_mode<synchronous>, transform_indices = @transform_16, window_bounds = array<i64: 1, 128>}, {pipeline_mode = #tpu.pipeline_mode<synchronous>, transform_indices = @transform_17, window_bounds = array<i64: 128, 128>}]} {
    %c0 = arith.constant 0 : index
    %c0_0 = arith.constant 0 : index
    %0 = vector.load %arg1[%c0, %c0_0] : memref<128x16xf32, #tpu.memory_space<vmem>>, vector<128x16xf32>
    %c0_1 = arith.constant 0 : index
    %c0_2 = arith.constant 0 : index
    %1 = vector.load %arg3[%c0_1, %c0_2] : memref<16x128xbf16, #tpu.memory_space<vmem>>, vector<16x128xbf16>
    %cst = arith.constant dense<0.000000e+00> : vector<128x128xf32>
    %2 = tpu.matmul %0, %1, %cst {dimension_numbers = #tpu.dot_dimension_numbers<[1], [0], [0], [1], [0, 0, 1, 1], [], []>} : vector<128x16xf32>, vector<16x128xbf16>, vector<128x128xf32> -> vector<128x128xf32>
    %c0_3 = arith.constant 0 : index
    %c0_4 = arith.constant 0 : index
    %3 = vector.load %arg4[%c0_3, %c0_4] : memref<1x128xf32, #tpu.memory_space<vmem>>, vector<1x128xf32>
    %4 = vector.broadcast %3 : vector<1x128xf32> to vector<128x128xf32>
    %5 = arith.addf %2, %4 : vector<128x128xf32>
    %cst_5 = arith.constant 0.000000e+00 : f32
    %6 = vector.broadcast %cst_5 : f32 to vector<128x128xf32>
    %7 = arith.cmpf oge, %5, %6 : vector<128x128xf32>
    %cst_6 = arith.constant 0.00999999977 : f32
    %8 = vector.broadcast %cst_6 : f32 to vector<128x128xf32>
    %9 = arith.mulf %8, %5 : vector<128x128xf32>
    %10 = arith.select %7, %5, %9 : vector<128x128xi1>, vector<128x128xf32>
    %11 = arith.truncf %10 : vector<128x128xf32> to vector<128x128xbf16>
    %c0_7 = arith.constant 0 : index
    %c0_8 = arith.constant 0 : index
    %12 = vector.load %arg19[%c0_7, %c0_8] : memref<128x128xbf16, #tpu.memory_space<vmem>>, vector<128x128xbf16>
    tpu.vector_store %arg19[%c0_7, %c0_8], %11 {strides = array<i32>} : memref<128x128xbf16, #tpu.memory_space<vmem>>, vector<128x128xbf16>,
    %c0_9 = arith.constant 0 : index
    %c0_10 = arith.constant 0 : index
    %13 = vector.load %arg2[%c0_9, %c0_10] : memref<128x256xbf16, #tpu.memory_space<vmem>>, vector<128x256xbf16>
    %c0_11 = arith.constant 0 : index
    %c0_12 = arith.constant 0 : index
    %14 = vector.load %arg19[%c0_11, %c0_12] : memref<128x128xbf16, #tpu.memory_space<vmem>>, vector<128x128xbf16>
    %c0_13 = arith.constant 0 : index
    %c0_14 = arith.constant 0 : index
    %15 = vector.load %arg6[%c0_13, %c0_14] : memref<128x128xbf16, #tpu.memory_space<vmem>>, vector<128x128xbf16>
    %cst_15 = arith.constant dense<0.000000e+00> : vector<128x128xf32>
    %16 = tpu.matmul %14, %15, %cst_15 {dimension_numbers = #tpu.dot_dimension_numbers<[1], [0], [0], [1], [0, 0, 1, 1], [], []>} : vector<128x128xbf16>, vector<128x128xbf16>, vector<128x128xf32> -> vector<128x128xf32>
    %c0_16 = arith.constant 0 : index
    %c0_17 = arith.constant 0 : index
    %17 = vector.load %arg7[%c0_16, %c0_17] : memref<1x128xf32, #tpu.memory_space<vmem>>, vector<1x128xf32>
    %18 = vector.broadcast %17 : vector<1x128xf32> to vector<128x128xf32>
    %19 = arith.addf %16, %18 : vector<128x128xf32>
    %c0_18 = arith.constant 0 : index
    %c0_19 = arith.constant 0 : index
    %c0_20 = arith.constant 0 : index
    %20 = vector.load %arg5[%c0_18, %c0_19, %c0_20] : memref<2x128x128xbf16, #tpu.memory_space<vmem>>, vector<1x128x128xbf16>
    %21 = vector.shape_cast %20 : vector<1x128x128xbf16> to vector<128x128xbf16>
    %cst_21 = arith.constant dense<0.000000e+00> : vector<128x128xf32>
    %22 = tpu.matmul %14, %21, %cst_21 {dimension_numbers = #tpu.dot_dimension_numbers<[1], [0], [0], [1], [0, 0, 1, 1], [], []>} : vector<128x128xbf16>, vector<128x128xbf16>, vector<128x128xf32> -> vector<128x128xf32>
    %23 = arith.truncf %22 : vector<128x128xf32> to vector<128x128xbf16>
    %c0_22 = arith.constant 0 : index
    %c0_23 = arith.constant 0 : index
    %24 = vector.load %arg20[%c0_22, %c0_23] : memref<256x128xbf16, #tpu.memory_space<vmem>>, vector<128x128xbf16>
    tpu.vector_store %arg20[%c0_22, %c0_23], %23 {strides = array<i32>} : memref<256x128xbf16, #tpu.memory_space<vmem>>, vector<128x128xbf16>,
    %c1 = arith.constant 1 : index
    %c0_24 = arith.constant 0 : index
    %c0_25 = arith.constant 0 : index
    %25 = vector.load %arg5[%c1, %c0_24, %c0_25] : memref<2x128x128xbf16, #tpu.memory_space<vmem>>, vector<1x128x128xbf16>
    %26 = vector.shape_cast %25 : vector<1x128x128xbf16> to vector<128x128xbf16>
    %cst_26 = arith.constant dense<0.000000e+00> : vector<128x128xf32>
    %27 = tpu.matmul %14, %26, %cst_26 {dimension_numbers = #tpu.dot_dimension_numbers<[1], [0], [0], [1], [0, 0, 1, 1], [], []>} : vector<128x128xbf16>, vector<128x128xbf16>, vector<128x128xf32> -> vector<128x128xf32>
    %28 = arith.truncf %27 : vector<128x128xf32> to vector<128x128xbf16>
    %c128 = arith.constant 128 : index
    %c0_27 = arith.constant 0 : index
    %29 = vector.load %arg20[%c128, %c0_27] : memref<256x128xbf16, #tpu.memory_space<vmem>>, vector<128x128xbf16>
    tpu.vector_store %arg20[%c128, %c0_27], %28 {strides = array<i32>} : memref<256x128xbf16, #tpu.memory_space<vmem>>, vector<128x128xbf16>,
    %c0_28 = arith.constant 0 : index
    %c0_29 = arith.constant 0 : index
    %30 = vector.load %arg20[%c0_28, %c0_29] : memref<256x128xbf16, #tpu.memory_space<vmem>>, vector<256x128xbf16>
    %cst_30 = arith.constant dense<0.000000e+00> : vector<128x128xf32>
    %31 = tpu.matmul %13, %30, %cst_30 {dimension_numbers = #tpu.dot_dimension_numbers<[1], [0], [0], [1], [0, 0, 1, 1], [], []>} : vector<128x256xbf16>, vector<256x128xbf16>, vector<128x128xf32> -> vector<128x128xf32>
    %32 = arith.addf %19, %31 : vector<128x128xf32>
    %33 = arith.truncf %32 : vector<128x128xf32> to vector<128x128xbf16>
    %c0_31 = arith.constant 0 : index
    %c0_32 = arith.constant 0 : index
    %34 = vector.load %arg19[%c0_31, %c0_32] : memref<128x128xbf16, #tpu.memory_space<vmem>>, vector<128x128xbf16>
    tpu.vector_store %arg19[%c0_31, %c0_32], %33 {strides = array<i32>} : memref<128x128xbf16, #tpu.memory_space<vmem>>, vector<128x128xbf16>,
    %c0_33 = arith.constant 0 : index
    %c0_34 = arith.constant 0 : index
    %35 = vector.load %arg19[%c0_33, %c0_34] : memref<128x128xbf16, #tpu.memory_space<vmem>>, vector<128x128xbf16>
    %c0_35 = arith.constant 0 : index
    %c0_36 = arith.constant 0 : index
    %36 = vector.load %arg9[%c0_35, %c0_36] : memref<128x128xbf16, #tpu.memory_space<vmem>>, vector<128x128xbf16>
    %cst_37 = arith.constant dense<0.000000e+00> : vector<128x128xf32>
    %37 = tpu.matmul %35, %36, %cst_37 {dimension_numbers = #tpu.dot_dimension_numbers<[1], [0], [0], [1], [0, 0, 1, 1], [], []>} : vector<128x128xbf16>, vector<128x128xbf16>, vector<128x128xf32> -> vector<128x128xf32>
    %c0_38 = arith.constant 0 : index
    %c0_39 = arith.constant 0 : index
    %38 = vector.load %arg10[%c0_38, %c0_39] : memref<1x128xf32, #tpu.memory_space<vmem>>, vector<1x128xf32>
    %39 = vector.broadcast %38 : vector<1x128xf32> to vector<128x128xf32>
    %40 = arith.addf %37, %39 : vector<128x128xf32>
    %c0_40 = arith.constant 0 : index
    %c0_41 = arith.constant 0 : index
    %c0_42 = arith.constant 0 : index
    %41 = vector.load %arg8[%c0_40, %c0_41, %c0_42] : memref<2x128x128xbf16, #tpu.memory_space<vmem>>, vector<1x128x128xbf16>
    %42 = vector.shape_cast %41 : vector<1x128x128xbf16> to vector<128x128xbf16>
    %cst_43 = arith.constant dense<0.000000e+00> : vector<128x128xf32>
    %43 = tpu.matmul %35, %42, %cst_43 {dimension_numbers = #tpu.dot_dimension_numbers<[1], [0], [0], [1], [0, 0, 1, 1], [], []>} : vector<128x128xbf16>, vector<128x128xbf16>, vector<128x128xf32> -> vector<128x128xf32>
    %44 = arith.truncf %43 : vector<128x128xf32> to vector<128x128xbf16>
    %c0_44 = arith.constant 0 : index
    %c0_45 = arith.constant 0 : index
    %45 = vector.load %arg20[%c0_44, %c0_45] : memref<256x128xbf16, #tpu.memory_space<vmem>>, vector<128x128xbf16>
    tpu.vector_store %arg20[%c0_44, %c0_45], %44 {strides = array<i32>} : memref<256x128xbf16, #tpu.memory_space<vmem>>, vector<128x128xbf16>,
    %c1_46 = arith.constant 1 : index
    %c0_47 = arith.constant 0 : index
    %c0_48 = arith.constant 0 : index
    %46 = vector.load %arg8[%c1_46, %c0_47, %c0_48] : memref<2x128x128xbf16, #tpu.memory_space<vmem>>, vector<1x128x128xbf16>
    %47 = vector.shape_cast %46 : vector<1x128x128xbf16> to vector<128x128xbf16>
    %cst_49 = arith.constant dense<0.000000e+00> : vector<128x128xf32>
    %48 = tpu.matmul %35, %47, %cst_49 {dimension_numbers = #tpu.dot_dimension_numbers<[1], [0], [0], [1], [0, 0, 1, 1], [], []>} : vector<128x128xbf16>, vector<128x128xbf16>, vector<128x128xf32> -> vector<128x128xf32>
    %49 = arith.truncf %48 : vector<128x128xf32> to vector<128x128xbf16>
    %c128_50 = arith.constant 128 : index
    %c0_51 = arith.constant 0 : index
    %50 = vector.load %arg20[%c128_50, %c0_51] : memref<256x128xbf16, #tpu.memory_space<vmem>>, vector<128x128xbf16>
    tpu.vector_store %arg20[%c128_50, %c0_51], %49 {strides = array<i32>} : memref<256x128xbf16, #tpu.memory_space<vmem>>, vector<128x128xbf16>,
    %c0_52 = arith.constant 0 : index
    %c0_53 = arith.constant 0 : index
    %51 = vector.load %arg20[%c0_52, %c0_53] : memref<256x128xbf16, #tpu.memory_space<vmem>>, vector<256x128xbf16>
    %cst_54 = arith.constant dense<0.000000e+00> : vector<128x128xf32>
    %52 = tpu.matmul %13, %51, %cst_54 {dimension_numbers = #tpu.dot_dimension_numbers<[1], [0], [0], [1], [0, 0, 1, 1], [], []>} : vector<128x256xbf16>, vector<256x128xbf16>, vector<128x128xf32> -> vector<128x128xf32>
    %53 = arith.addf %40, %52 : vector<128x128xf32>
    %54 = arith.truncf %53 : vector<128x128xf32> to vector<128x128xbf16>
    %c0_55 = arith.constant 0 : index
    %c0_56 = arith.constant 0 : index
    %55 = vector.load %arg19[%c0_55, %c0_56] : memref<128x128xbf16, #tpu.memory_space<vmem>>, vector<128x128xbf16>
    tpu.vector_store %arg19[%c0_55, %c0_56], %54 {strides = array<i32>} : memref<128x128xbf16, #tpu.memory_space<vmem>>, vector<128x128xbf16>,
    %c0_57 = arith.constant 0 : index
    %c0_58 = arith.constant 0 : index
    %56 = vector.load %arg19[%c0_57, %c0_58] : memref<128x128xbf16, #tpu.memory_space<vmem>>, vector<128x128xbf16>
    %c0_59 = arith.constant 0 : index
    %c0_60 = arith.constant 0 : index
    %57 = vector.load %arg12[%c0_59, %c0_60] : memref<128x128xbf16, #tpu.memory_space<vmem>>, vector<128x128xbf16>
    %cst_61 = arith.constant dense<0.000000e+00> : vector<128x128xf32>
    %58 = tpu.matmul %56, %57, %cst_61 {dimension_numbers = #tpu.dot_dimension_numbers<[1], [0], [0], [1], [0, 0, 1, 1], [], []>} : vector<128x128xbf16>, vector<128x128xbf16>, vector<128x128xf32> -> vector<128x128xf32>
    %c0_62 = arith.constant 0 : index
    %c0_63 = arith.constant 0 : index
    %59 = vector.load %arg13[%c0_62, %c0_63] : memref<1x128xf32, #tpu.memory_space<vmem>>, vector<1x128xf32>
    %60 = vector.broadcast %59 : vector<1x128xf32> to vector<128x128xf32>
    %61 = arith.addf %58, %60 : vector<128x128xf32>
    %c0_64 = arith.constant 0 : index
    %c0_65 = arith.constant 0 : index
    %c0_66 = arith.constant 0 : index
    %62 = vector.load %arg11[%c0_64, %c0_65, %c0_66] : memref<2x128x128xbf16, #tpu.memory_space<vmem>>, vector<1x128x128xbf16>
    %63 = vector.shape_cast %62 : vector<1x128x128xbf16> to vector<128x128xbf16>
    %cst_67 = arith.constant dense<0.000000e+00> : vector<128x128xf32>
    %64 = tpu.matmul %56, %63, %cst_67 {dimension_numbers = #tpu.dot_dimension_numbers<[1], [0], [0], [1], [0, 0, 1, 1], [], []>} : vector<128x128xbf16>, vector<128x128xbf16>, vector<128x128xf32> -> vector<128x128xf32>
    %65 = arith.truncf %64 : vector<128x128xf32> to vector<128x128xbf16>
    %c0_68 = arith.constant 0 : index
    %c0_69 = arith.constant 0 : index
    %66 = vector.load %arg20[%c0_68, %c0_69] : memref<256x128xbf16, #tpu.memory_space<vmem>>, vector<128x128xbf16>
    tpu.vector_store %arg20[%c0_68, %c0_69], %65 {strides = array<i32>} : memref<256x128xbf16, #tpu.memory_space<vmem>>, vector<128x128xbf16>,
    %c1_70 = arith.constant 1 : index
    %c0_71 = arith.constant 0 : index
    %c0_72 = arith.constant 0 : index
    %67 = vector.load %arg11[%c1_70, %c0_71, %c0_72] : memref<2x128x128xbf16, #tpu.memory_space<vmem>>, vector<1x128x128xbf16>
    %68 = vector.shape_cast %67 : vector<1x128x128xbf16> to vector<128x128xbf16>
    %cst_73 = arith.constant dense<0.000000e+00> : vector<128x128xf32>
    %69 = tpu.matmul %56, %68, %cst_73 {dimension_numbers = #tpu.dot_dimension_numbers<[1], [0], [0], [1], [0, 0, 1, 1], [], []>} : vector<128x128xbf16>, vector<128x128xbf16>, vector<128x128xf32> -> vector<128x128xf32>
    %70 = arith.truncf %69 : vector<128x128xf32> to vector<128x128xbf16>
    %c128_74 = arith.constant 128 : index
    %c0_75 = arith.constant 0 : index
    %71 = vector.load %arg20[%c128_74, %c0_75] : memref<256x128xbf16, #tpu.memory_space<vmem>>, vector<128x128xbf16>
    tpu.vector_store %arg20[%c128_74, %c0_75], %70 {strides = array<i32>} : memref<256x128xbf16, #tpu.memory_space<vmem>>, vector<128x128xbf16>,
    %c0_76 = arith.constant 0 : index
    %c0_77 = arith.constant 0 : index
    %72 = vector.load %arg20[%c0_76, %c0_77] : memref<256x128xbf16, #tpu.memory_space<vmem>>, vector<256x128xbf16>
    %cst_78 = arith.constant dense<0.000000e+00> : vector<128x128xf32>
    %73 = tpu.matmul %13, %72, %cst_78 {dimension_numbers = #tpu.dot_dimension_numbers<[1], [0], [0], [1], [0, 0, 1, 1], [], []>} : vector<128x256xbf16>, vector<256x128xbf16>, vector<128x128xf32> -> vector<128x128xf32>
    %74 = arith.addf %61, %73 : vector<128x128xf32>
    %75 = arith.truncf %74 : vector<128x128xf32> to vector<128x128xbf16>
    %c0_79 = arith.constant 0 : index
    %c0_80 = arith.constant 0 : index
    %76 = vector.load %arg19[%c0_79, %c0_80] : memref<128x128xbf16, #tpu.memory_space<vmem>>, vector<128x128xbf16>
    tpu.vector_store %arg19[%c0_79, %c0_80], %75 {strides = array<i32>} : memref<128x128xbf16, #tpu.memory_space<vmem>>, vector<128x128xbf16>,
    %c0_81 = arith.constant 0 : index
    %c0_82 = arith.constant 0 : index
    %77 = vector.load %arg19[%c0_81, %c0_82] : memref<128x128xbf16, #tpu.memory_space<vmem>>, vector<128x128xbf16>
    %c0_83 = arith.constant 0 : index
    %c0_84 = arith.constant 0 : index
    %78 = vector.load %arg14[%c0_83, %c0_84] : memref<128x128xbf16, #tpu.memory_space<vmem>>, vector<128x128xbf16>
    %cst_85 = arith.constant dense<0.000000e+00> : vector<128x128xf32>
    %79 = tpu.matmul %77, %78, %cst_85 {dimension_numbers = #tpu.dot_dimension_numbers<[1], [0], [0], [1], [0, 0, 1, 1], [], []>} : vector<128x128xbf16>, vector<128x128xbf16>, vector<128x128xf32> -> vector<128x128xf32>
    %c0_86 = arith.constant 0 : index
    %c0_87 = arith.constant 0 : index
    %80 = vector.load %arg15[%c0_86, %c0_87] : memref<1x128xf32, #tpu.memory_space<vmem>>, vector<1x128xf32>
    %81 = vector.broadcast %80 : vector<1x128xf32> to vector<128x128xf32>
    %82 = arith.addf %79, %81 : vector<128x128xf32>
    %cst_88 = arith.constant 0.000000e+00 : f32
    %83 = vector.broadcast %cst_88 : f32 to vector<128x128xf32>
    %84 = arith.cmpf oge, %82, %83 : vector<128x128xf32>
    %cst_89 = arith.constant 0.00999999977 : f32
    %85 = vector.broadcast %cst_89 : f32 to vector<128x128xf32>
    %86 = arith.mulf %85, %82 : vector<128x128xf32>
    %87 = arith.select %84, %82, %86 : vector<128x128xi1>, vector<128x128xf32>
    %88 = arith.truncf %87 : vector<128x128xf32> to vector<128x128xbf16>
    %c0_90 = arith.constant 0 : index
    %c0_91 = arith.constant 0 : index
    %89 = vector.load %arg16[%c0_90, %c0_91] : memref<128x128xbf16, #tpu.memory_space<vmem>>, vector<128x128xbf16>
    %cst_92 = arith.constant dense<0.000000e+00> : vector<128x128xf32>
    %90 = tpu.matmul %88, %89, %cst_92 {dimension_numbers = #tpu.dot_dimension_numbers<[1], [0], [0], [1], [0, 0, 1, 1], [], []>} : vector<128x128xbf16>, vector<128x128xbf16>, vector<128x128xf32> -> vector<128x128xf32>
    %c0_93 = arith.constant 0 : index
    %c0_94 = arith.constant 0 : index
    %91 = vector.load %arg17[%c0_93, %c0_94] : memref<1x128xf32, #tpu.memory_space<vmem>>, vector<1x128xf32>
    %92 = vector.broadcast %91 : vector<1x128xf32> to vector<128x128xf32>
    %93 = arith.addf %90, %92 : vector<128x128xf32>
    %c0_95 = arith.constant 0 : index
    %c0_96 = arith.constant 0 : index
    %94 = vector.load %arg18[%c0_95, %c0_96] : memref<128x128xf32, #tpu.memory_space<vmem>>, vector<128x128xf32>
    tpu.vector_store %arg18[%c0_95, %c0_96], %93 {strides = array<i32>} : memref<128x128xf32, #tpu.memory_space<vmem>>, vector<128x128xf32>,
    return
  }
  func.func @transform_0(%arg0: i32) -> (i32, i32) {
    %c0_i32 = arith.constant 0 : i32
    %c0_i32_0 = arith.constant 0 : i32
    %c0_i32_1 = arith.constant 0 : i32
    return %c0_i32, %c0_i32_0 : i32, i32
  }
  func.func @transform_1(%arg0: i32) -> (i32, i32) {
    %c0_i32 = arith.constant 0 : i32
    %c0_i32_0 = arith.constant 0 : i32
    %c0_i32_1 = arith.constant 0 : i32
    return %c0_i32, %c0_i32_0 : i32, i32
  }
  func.func @transform_2(%arg0: i32) -> (i32, i32) {
    %c0_i32 = arith.constant 0 : i32
    %c0_i32_0 = arith.constant 0 : i32
    %c0_i32_1 = arith.constant 0 : i32
    return %c0_i32, %c0_i32_0 : i32, i32
  }
  func.func @transform_3(%arg0: i32) -> (i32, i32) {
    %c0_i32 = arith.constant 0 : i32
    %c0_i32_0 = arith.constant 0 : i32
    %c0_i32_1 = arith.constant 0 : i32
    return %c0_i32, %c0_i32_0 : i32, i32
  }
  func.func @transform_4(%arg0: i32) -> (i32, i32, i32) {
    %c0_i32 = arith.constant 0 : i32
    %c0_i32_0 = arith.constant 0 : i32
    %c0_i32_1 = arith.constant 0 : i32
    %c0_i32_2 = arith.constant 0 : i32
    return %c0_i32, %c0_i32_0, %c0_i32_1 : i32, i32, i32
  }
  func.func @transform_5(%arg0: i32) -> (i32, i32) {
    %c0_i32 = arith.constant 0 : i32
    %c0_i32_0 = arith.constant 0 : i32
    %c0_i32_1 = arith.constant 0 : i32
    return %c0_i32, %c0_i32_0 : i32, i32
  }
  func.func @transform_6(%arg0: i32) -> (i32, i32) {
    %c0_i32 = arith.constant 0 : i32
    %c0_i32_0 = arith.constant 0 : i32
    %c0_i32_1 = arith.constant 0 : i32
    return %c0_i32, %c0_i32_0 : i32, i32
  }
  func.func @transform_7(%arg0: i32) -> (i32, i32, i32) {
    %c0_i32 = arith.constant 0 : i32
    %c0_i32_0 = arith.constant 0 : i32
    %c0_i32_1 = arith.constant 0 : i32
    %c0_i32_2 = arith.constant 0 : i32
    return %c0_i32, %c0_i32_0, %c0_i32_1 : i32, i32, i32
  }
  func.func @transform_8(%arg0: i32) -> (i32, i32) {
    %c0_i32 = arith.constant 0 : i32
    %c0_i32_0 = arith.constant 0 : i32
    %c0_i32_1 = arith.constant 0 : i32
    return %c0_i32, %c0_i32_0 : i32, i32
  }
  func.func @transform_9(%arg0: i32) -> (i32, i32) {
    %c0_i32 = arith.constant 0 : i32
    %c0_i32_0 = arith.constant 0 : i32
    %c0_i32_1 = arith.constant 0 : i32
    return %c0_i32, %c0_i32_0 : i32, i32
  }
  func.func @transform_10(%arg0: i32) -> (i32, i32, i32) {
    %c0_i32 = arith.constant 0 : i32
    %c0_i32_0 = arith.constant 0 : i32
    %c0_i32_1 = arith.constant 0 : i32
    %c0_i32_2 = arith.constant 0 : i32
    return %c0_i32, %c0_i32_0, %c0_i32_1 : i32, i32, i32
  }
  func.func @transform_11(%arg0: i32) -> (i32, i32) {
    %c0_i32 = arith.constant 0 : i32
    %c0_i32_0 = arith.constant 0 : i32
    %c0_i32_1 = arith.constant 0 : i32
    return %c0_i32, %c0_i32_0 : i32, i32
  }
  func.func @transform_12(%arg0: i32) -> (i32, i32) {
    %c0_i32 = arith.constant 0 : i32
    %c0_i32_0 = arith.constant 0 : i32
    %c0_i32_1 = arith.constant 0 : i32
    return %c0_i32, %c0_i32_0 : i32, i32
  }
  func.func @transform_13(%arg0: i32) -> (i32, i32) {
    %c0_i32 = arith.constant 0 : i32
    %c0_i32_0 = arith.constant 0 : i32
    %c0_i32_1 = arith.constant 0 : i32
    return %c0_i32, %c0_i32_0 : i32, i32
  }
  func.func @transform_14(%arg0: i32) -> (i32, i32) {
    %c0_i32 = arith.constant 0 : i32
    %c0_i32_0 = arith.constant 0 : i32
    %c0_i32_1 = arith.constant 0 : i32
    return %c0_i32, %c0_i32_0 : i32, i32
  }
  func.func @transform_15(%arg0: i32) -> (i32, i32) {
    %c0_i32 = arith.constant 0 : i32
    %c0_i32_0 = arith.constant 0 : i32
    %c0_i32_1 = arith.constant 0 : i32
    return %c0_i32, %c0_i32_0 : i32, i32
  }
  func.func @transform_16(%arg0: i32) -> (i32, i32) {
    %c0_i32 = arith.constant 0 : i32
    %c0_i32_0 = arith.constant 0 : i32
    %c0_i32_1 = arith.constant 0 : i32
    return %c0_i32, %c0_i32_0 : i32, i32
  }
  func.func @transform_17(%arg0: i32) -> (i32, i32) {
    %c0_i32 = arith.constant 0 : i32
    %c0_i32_0 = arith.constant 0 : i32
    %c0_i32_1 = arith.constant 0 : i32
    return %c0_i32, %c0_i32_0 : i32, i32
  }
}

</mosaic_0001>

<bundles_post_ra>
// kernel: complex_rgcn_forward.1
= control target key start
LH: loop header
LB: loop body
LE: loop exit
PB: predicated region body
PF: predicated region fallthrough
CT: control target
= control target key end

     0   :  { %vm85_vm0 = vcmask 130048   ;;  %s5381_s2 = inlined_call_operand.vmem [shape: bf16[16,128], index: 2, kind: input, shape index: {}]   ;;  %s5382_s0 = inlined_call_operand.vmem [shape: f32[128,16], index: 0, kind: input, shape index: {}]   ;;  %s5383_s3 = inlined_call_operand.vmem [shape: f32[1,128], index: 3, kind: input, shape index: {}]   ;;  %s5384_s5 = inlined_call_operand.vmem [shape: bf16[128,128], index: 5, kind: input, shape index: {}]   ;;  %s5385_s4 = inlined_call_operand.vmem [shape: bf16[2,128,128], index: 4, kind: input, shape index: {}]   ;;  %s5386_s6 = inlined_call_operand.vmem [shape: f32[1,128], index: 6, kind: input, shape index: {}]   ;;  %s5387_s1 = inlined_call_operand.vmem [shape: bf16[128,256], index: 1, kind: input, shape index: {}]   ;;  %s5388_s8 = inlined_call_operand.vmem [shape: bf16[128,128], index: 8, kind: input, shape index: {}]   ;;  %s5389_s7 = inlined_call_operand.vmem [shape: bf16[2,128,128], index: 7, kind: input, shape index: {}]   ;;  %s5390_s9 = inlined_call_operand.vmem [shape: f32[1,128], index: 9, kind: input, shape index: {}]   ;;  %s5391_s11 = inlined_call_operand.vmem [shape: bf16[128,128], index: 11, kind: input, shape index: {}]   ;;  %s5392_s10 = inlined_call_operand.vmem [shape: bf16[2,128,128], index: 10, kind: input, shape index: {}]   ;;  %s5393_s12 = inlined_call_operand.vmem [shape: f32[1,128], index: 12, kind: input, shape index: {}]   ;;  %s5394_s13 = inlined_call_operand.vmem [shape: bf16[128,128], index: 13, kind: input, shape index: {}]   ;;  %s5395_s14 = inlined_call_operand.vmem [shape: f32[1,128], index: 14, kind: input, shape index: {}]   ;;  %s5396_s15 = inlined_call_operand.vmem [shape: bf16[128,128], index: 15, kind: input, shape index: {}]   ;;  %s5397_s16 = inlined_call_operand.vmem [shape: f32[1,128], index: 16, kind: input, shape index: {}]   ;;  %s5398_s17 = inlined_call_operand.vmem [shape: f32[128,128], index: 17, kind: output, shape index: {}]  }
   0x1   :  { %5400 = sst [smem:[#allocation4_spill]] %s5381_s2  ;;  %v3815_v13 = vld [vmem:[%s5384_s5 + $0x38] sm:$0xff]  ;;  %v3814_v14 = vld [vmem:[%s5384_s5 + $0x30] sm:$0xff]  ;;  %v3813_v19 = vld [vmem:[%s5384_s5 + $0x28] sm:$0xff] }
   0x2   :  { %5401 = sst [smem:[#allocation5_spill]] %s5382_s0  ;;  %419 = vmatpush.bf16.msra.mxu1 %v3815_v13  ;;  %4442 = vmatpush.bf16.msra.mxu2 %v3815_v13  ;;  %v3812_v20 = vld [vmem:[%s5384_s5 + $0x20] sm:$0xff]  ;;  %v3811_v21 = vld [vmem:[%s5384_s5 + $0x18] sm:$0xff]  ;;  %v3810_v22 = vld [vmem:[%s5384_s5 + $0x10] sm:$0xff] }
   0x3   :  { %s5402_s26 = sld [smem:[#allocation4_spill]]  ;;  %v3809_v23 = vld [vmem:[%s5384_s5 + $0x8] sm:$0xff]  ;;  %v3808_v24 = vld [vmem:[%s5384_s5] sm:$0xff]  ;;  %v3831_v39 = vld [vmem:[%s5385_s4 + $0x78] sm:$0xff] }
   0x4   :  { %s5403_s29 = sld [smem:[#allocation5_spill]]  ;;  %v4648_v26 = vld [vmem:[%s5383_s3] ss:$0 sm:$0xff]  ;;  %v3830_v44 = vld [vmem:[%s5385_s4 + $0x70] sm:$0xff]  ;;  %v3829_v49 = vld [vmem:[%s5385_s4 + $0x68] sm:$0xff] }
   0x5   :  { %v3828_v55 = vld [vmem:[%s5385_s4 + $0x60] sm:$0xff]  ;;  %v3827_v62 = vld [vmem:[%s5385_s4 + $0x58] sm:$0xff] }
   0x6   :  { %420 = vmatpush.bf16.msra.mxu1 %v3814_v14  ;;  %4444 = vmatpush.bf16.msra.mxu2 %v3814_v14 }
   0x9   :  { %v3783_v0 = vld [vmem:[%s5402_s26] sm:$0xff] }
   0xa   :  { %141 = vmatpush.bf16.msra.mxu0 %v3783_v0  ;;  %4441 = vmatpush.bf16.msra.mxu3 %v3783_v0  ;;  %v57_v1 = vld [vmem:[%s5403_s29] sm:$0xff]  ;;  %v67_v2 = vld [vmem:[%s5403_s29 + $0x50] sm:$0xff]  ;;  %v58_v3 = vld [vmem:[%s5403_s29 + $0x8] sm:$0xff] }
   0xb   :  { %v68_v4 = vld [vmem:[%s5403_s29 + $0x58] sm:$0xff]  ;;  %v59_v5 = vld [vmem:[%s5403_s29 + $0x10] sm:$0xff]  ;;  %v69_v6 = vld [vmem:[%s5403_s29 + $0x60] sm:$0xff]  ;;  %421 = vmatpush.bf16.msra.mxu1 %v3813_v19  ;;  %4446 = vmatpush.bf16.msra.mxu2 %v3813_v19 }
   0xc   :  { %v60_v7 = vld [vmem:[%s5403_s29 + $0x18] sm:$0xff]  ;;  %v70_v8 = vld [vmem:[%s5403_s29 + $0x68] sm:$0xff]  ;;  %v61_v9 = vld [vmem:[%s5403_s29 + $0x20] sm:$0xff] }
   0xd   :  { %2983 = vmatmul.msk.f32.vlgmr.msra.gmra.mxu0 %vm85_vm0, %v57_v1  ;;  %2993 = vmatmul.msk.f32.vlgmr.msra.gmra.mxu3 %vm85_vm0, %v67_v2  ;;  %v71_v10 = vld [vmem:[%s5403_s29 + $0x70] sm:$0xff]  ;;  %v62_v11 = vld [vmem:[%s5403_s29 + $0x28] sm:$0xff]  ;;  %v72_v12 = vld [vmem:[%s5403_s29 + $0x78] sm:$0xff] }
   0xe   :  { %4443 = vmatpush.bf16.msrb.mxu3 %v3815_v13  ;;  %v63_v15 = vld [vmem:[%s5403_s29 + $0x30] sm:$0xff]  ;;  %v64_v16 = vld [vmem:[%s5403_s29 + $0x38] sm:$0xff]  ;;  %v65_v17 = vld [vmem:[%s5403_s29 + $0x40] sm:$0xff] }
   0xf   :  { %v66_v18 = vld [vmem:[%s5403_s29 + $0x48] sm:$0xff]  ;;  %422 = vmatpush.bf16.msra.mxu1 %v3812_v20  ;;  %4448 = vmatpush.bf16.msra.mxu2 %v3812_v20 }
  0x12   :  { %4445 = vmatpush.bf16.msrb.mxu3 %v3814_v14  ;;  %v3824_v14 = vld [vmem:[%s5385_s4 + $0x40] sm:$0xff] }
  0x13   :  { %423 = vmatpush.bf16.msra.mxu1 %v3811_v21  ;;  %4450 = vmatpush.bf16.msra.mxu2 %v3811_v21 }
  0x15   :  { %2984 = vmatmul.msk.f32.gmra.mxu0 %vm85_vm0, %v58_v3  ;;  %2994 = vmatmul.msk.f32.gmra.mxu3 %vm85_vm0, %v68_v4  ;;  %v3826_v3 = vld [vmem:[%s5385_s4 + $0x50] sm:$0xff] }
  0x16   :  { %4447 = vmatpush.bf16.msrb.mxu3 %v3813_v19 }
  0x17   :  { %424 = vmatpush.bf16.msra.mxu1 %v3810_v22  ;;  %4452 = vmatpush.bf16.msra.mxu2 %v3810_v22 }
  0x1a   :  { %4449 = vmatpush.bf16.msrb.mxu3 %v3812_v20 }
  0x1b   :  { %425 = vmatpush.bf16.msra.mxu1 %v3809_v23  ;;  %4454 = vmatpush.bf16.msra.mxu2 %v3809_v23 }
  0x1d   :  { %2985 = vmatmul.msk.f32.gmra.mxu0 %vm85_vm0, %v59_v5  ;;  %2995 = vmatmul.msk.f32.gmra.mxu3 %vm85_vm0, %v69_v6 }
  0x1e   :  { %4451 = vmatpush.bf16.msrb.mxu3 %v3811_v21 }
  0x1f   :  { %426 = vmatpush.bf16.msra.mxu1 %v3808_v24  ;;  %4456 = vmatpush.bf16.msra.mxu2 %v3808_v24 }
  0x22   :  { %4453 = vmatpush.bf16.msrb.mxu3 %v3810_v22 }
  0x25   :  { %2986 = vmatmul.msk.f32.gmra.mxu0 %vm85_vm0, %v60_v7  ;;  %2996 = vmatmul.msk.f32.gmra.mxu3 %vm85_vm0, %v70_v8  ;;  %v3825_v8 = vld [vmem:[%s5385_s4 + $0x48] sm:$0xff] }
  0x26   :  { %4455 = vmatpush.bf16.msrb.mxu3 %v3809_v23 }
  0x2a   :  { %4457 = vmatpush.bf16.msrb.mxu3 %v3808_v24 }
  0x2d   :  { %2987 = vmatmul.msk.f32.gmra.mxu0 %vm85_vm0, %v61_v9  ;;  %2997 = vmatmul.msk.f32.gmra.mxu3 %vm85_vm0, %v71_v10 }
  0x2e   :  { %678 = vmatpush.bf16.msra.mxu3 %v3831_v39 }
  0x32   :  { %679 = vmatpush.bf16.msra.mxu3 %v3830_v44 }
  0x35   :  { %2988 = vmatmul.msk.f32.gmra.mxu0 %vm85_vm0, %v62_v11  ;;  %2998 = vmatmul.msk.f32.gmra.mxu3 %vm85_vm0, %v72_v12 }
  0x36   :  { %680 = vmatpush.bf16.msra.mxu3 %v3829_v49 }
  0x3a   :  { %681 = vmatpush.bf16.msra.mxu3 %v3828_v55 }
  0x3d   :  { %2989 = vmatmul.msk.f32.gmra.mxu0 %vm85_vm0, %v63_v15 }
  0x3e   :  { %682 = vmatpush.bf16.msra.mxu3 %v3827_v62 }
  0x42   :  { %683 = vmatpush.bf16.msra.mxu3 %v3826_v3 }
  0x45   :  { %2990 = vmatmul.msk.f32.gmra.mxu0 %vm85_vm0, %v64_v16 }
  0x46   :  { %684 = vmatpush.bf16.msra.mxu3 %v3825_v8 }
  0x4a   :  { %685 = vmatpush.bf16.msra.mxu3 %v3824_v14 }
  0x4d   :  { %2991 = vmatmul.msk.f32.gmra.mxu0 %vm85_vm0, %v65_v17 }
  0x55   :  { %2992 = vmatmul.msk.f32.gmra.mxu0 %vm85_vm0, %v66_v18 }
  0x8a   :  { %v143_v25 = vpop.f32.mrf.mxu0 }
  0x8b   :  { %v144_v27 = vadd.f32 %v4648_v26, %v143_v25 }
  0x8d   :  { %v207_v30 = vmul.f32 0.01, %v144_v27  ;;  %vm191_vm1 = vcmp.ge.f32.partialorder %v144_v27, 0.0 }
  0x8f   :  { %v223_v34 = vsel %vm191_vm1, %v144_v27, %v207_v30 }
  0x90   :  { %v173_v28 = vpop.f32.mrf.mxu3 }
  0x91   :  { %v174_v31 = vadd.f32 %v4648_v26, %v173_v28 }
  0x92   :  { %v146_v29 = vpop.f32.mrf.mxu0 }
  0x93   :  { %v147_v32 = vadd.f32 %v4648_v26, %v146_v29  ;;  %v217_v35 = vmul.f32 0.01, %v174_v31  ;;  %vm201_vm3 = vcmp.ge.f32.partialorder %v174_v31, 0.0 }
  0x95   :  { %vm192_vm2 = vcmp.ge.f32.partialorder %v147_v32, 0.0  ;;  %v208_v33 = vmul.f32 0.01, %v147_v32  ;;  %v233_v42 = vsel %vm201_vm3, %v174_v31, %v217_v35  ;;  %v3822_v35 = vld [vmem:[%s5385_s4 + $0x30] sm:$0xff] }
  0x97   :  { %v224_v36 = vsel %vm192_vm2, %v147_v32, %v208_v33  ;;  %v3823_v32 = vld [vmem:[%s5385_s4 + $0x38] sm:$0xff] }
  0x98   :  { %v3971_v37 = vpack.c.bf16 %v224_v36, %v223_v34  ;;  %v176_v38 = vpop.f32.mrf.mxu3  ;;  %532 = vmatpush.bf16.msrb.mxu2 %v3823_v32 }
  0x99   :  { %v177_v40 = vadd.f32 %v4648_v26, %v176_v38 }
  0x9a   :  { %3972 = vst [vmem:[#allocation2 + $0x30] sm:$0xff] %v3971_v37   ;;  %v149_v41 = vpop.f32.mrf.mxu0 }
  0x9b   :  { %vm202_vm4 = vcmp.ge.f32.partialorder %v177_v40, 0.0  ;;  %v218_v43 = vmul.f32 0.01, %v177_v40  ;;  %v150_v47 = vadd.f32 %v4648_v26, %v149_v41  ;;  %v3821_v41 = vld [vmem:[%s5385_s4 + $0x28] sm:$0xff] }
  0x9c   :  { %533 = vmatpush.bf16.msrb.mxu2 %v3822_v35 }
  0x9d   :  { %v234_v45 = vsel %vm202_vm4, %v177_v40, %v218_v43  ;;  %v209_v52 = vmul.f32 0.01, %v150_v47  ;;  %vm193_vm5 = vcmp.ge.f32.partialorder %v150_v47, 0.0  ;;  %v3820_v43 = vld [vmem:[%s5385_s4 + $0x20] sm:$0xff] }
  0x9e   :  { %v3996_v46 = vpack.c.bf16 %v234_v45, %v233_v42 }
  0x9f   :  { %v225_v57 = vsel %vm193_vm5, %v150_v47, %v209_v52  ;;  %v3819_v47 = vld [vmem:[%s5385_s4 + $0x18] sm:$0xff] }
  0xa0   :  { %4372 = vst [vmem:[#allocation2 + $0x20] sm:$0xff] %v3996_v46   ;;  %v179_v48 = vpop.f32.mrf.mxu3  ;;  %534 = vmatpush.bf16.msrb.mxu2 %v3821_v41 }
  0xa1   :  { %v4664_v50 = vld [vmem:[#allocation2 + $0x30] sm:$0xff]  ;;  %v180_v53 = vadd.f32 %v4648_v26, %v179_v48 }
  0xa2   :  { %v152_v51 = vpop.f32.mrf.mxu0  ;;  %427 = vmatmul.bf16.vlgmr.msra.gmra.mxu1 %v4664_v50 }
  0xa3   :  { %v153_v54 = vadd.f32 %v4648_v26, %v152_v51  ;;  %v219_v58 = vmul.f32 0.01, %v180_v53  ;;  %vm203_vm7 = vcmp.ge.f32.partialorder %v180_v53, 0.0  ;;  %v3818_v51 = vld [vmem:[%s5385_s4 + $0x10] sm:$0xff] }
  0xa4   :  { %535 = vmatpush.bf16.msrb.mxu2 %v3820_v43 }
  0xa5   :  { %vm194_vm6 = vcmp.ge.f32.partialorder %v153_v54, 0.0  ;;  %v210_v56 = vmul.f32 0.01, %v153_v54  ;;  %v235_v1 = vsel %vm203_vm7, %v180_v53, %v219_v58 }
  0xa7   :  { %v226_v59 = vsel %vm194_vm6, %v153_v54, %v210_v56  ;;  %v3817_v56 = vld [vmem:[%s5385_s4 + $0x8] sm:$0xff]  ;;  %v3805_v58 = vld [vmem:[#allocation2 + $0x20] sm:$0xff] }
  0xa8   :  { %v3976_v60 = vpack.c.bf16 %v226_v59, %v225_v57  ;;  %v182_v61 = vpop.f32.mrf.mxu3  ;;  %536 = vmatpush.bf16.msrb.mxu2 %v3819_v47 }
  0xa9   :  { %v183_v63 = vadd.f32 %v4648_v26, %v182_v61 }
  0xaa   :  { %4368 = vst [vmem:[#allocation2] sm:$0xff] %v3976_v60   ;;  %v155_v0 = vpop.f32.mrf.mxu0 }
  0xab   :  { %vm204_vm8 = vcmp.ge.f32.partialorder %v183_v63, 0.0  ;;  %v220_v2 = vmul.f32 0.01, %v183_v63  ;;  %v156_v6 = vadd.f32 %v4648_v26, %v155_v0 }
  0xac   :  { %537 = vmatpush.bf16.msrb.mxu2 %v3818_v51 }
  0xad   :  { %v236_v4 = vsel %vm204_vm8, %v183_v63, %v220_v2  ;;  %v211_v11 = vmul.f32 0.01, %v156_v6  ;;  %vm195_vm9 = vcmp.ge.f32.partialorder %v156_v6, 0.0 }
  0xae   :  { %v4001_v5 = vpack.c.bf16 %v236_v4, %v235_v1 }
  0xaf   :  { %v227_v16 = vsel %vm195_vm9, %v156_v6, %v211_v11 }
  0xb0   :  { %4373 = vst [vmem:[#allocation2 + $0x28] sm:$0xff] %v4001_v5   ;;  %v185_v7 = vpop.f32.mrf.mxu3  ;;  %538 = vmatpush.bf16.msrb.mxu2 %v3817_v56 }
  0xb1   :  { %v4683_v9 = vld [vmem:[#allocation2] sm:$0xff]  ;;  %v186_v12 = vadd.f32 %v4648_v26, %v185_v7 }
  0xb2   :  { %v158_v10 = vpop.f32.mrf.mxu0  ;;  %432 = vmatmul.bf16.gmra.mxu1 %v4683_v9 }
  0xb3   :  { %v159_v13 = vadd.f32 %v4648_v26, %v158_v10  ;;  %v221_v17 = vmul.f32 0.01, %v186_v12  ;;  %vm205_vm11 = vcmp.ge.f32.partialorder %v186_v12, 0.0 }
  0xb5   :  { %vm196_vm10 = vcmp.ge.f32.partialorder %v159_v13, 0.0  ;;  %v212_v15 = vmul.f32 0.01, %v159_v13  ;;  %v237_v24 = vsel %vm205_vm11, %v186_v12, %v221_v17 }
  0xb7   :  { %v228_v18 = vsel %vm196_vm10, %v159_v13, %v212_v15  ;;  %v4691_v19 = vld [vmem:[#allocation2 + $0x28] sm:$0xff] }
  0xb8   :  { %v3981_v20 = vpack.c.bf16 %v228_v18, %v227_v16  ;;  %v188_v21 = vpop.f32.mrf.mxu3  ;;  %457 = vmatmul.bf16.vlgmr.msrb.gmra.mxu3 %v4691_v19 }
  0xb9   :  { %v189_v22 = vadd.f32 %v4648_v26, %v188_v21 }
  0xba   :  { %4369 = vst [vmem:[#allocation2 + $0x18] sm:$0xff] %v3981_v20   ;;  %v161_v23 = vpop.f32.mrf.mxu0 }
  0xbb   :  { %vm206_vm12 = vcmp.ge.f32.partialorder %v189_v22, 0.0  ;;  %v222_v25 = vmul.f32 0.01, %v189_v22  ;;  %v162_v29 = vadd.f32 %v4648_v26, %v161_v23 }
  0xbd   :  { %v238_v27 = vsel %vm206_vm12, %v189_v22, %v222_v25  ;;  %v213_v33 = vmul.f32 0.01, %v162_v29  ;;  %vm197_vm13 = vcmp.ge.f32.partialorder %v162_v29, 0.0 }
  0xbe   :  { %v4006_v28 = vpack.c.bf16 %v238_v27, %v237_v24 }
  0xbf   :  { %v229_v37 = vsel %vm197_vm13, %v162_v29, %v213_v33 }
  0xc0   :  { %4374 = vst [vmem:[#allocation2 + $0x38] sm:$0xff] %v4006_v28  }
  0xc1   :  { %v3802_v30 = vld [vmem:[#allocation2 + $0x18] sm:$0xff] }
  0xc2   :  { %v164_v31 = vpop.f32.mrf.mxu0  ;;  %437 = vmatmul.bf16.vlgmr.msra.gmra.mxu2 %v3802_v30 }
  0xc3   :  { %v165_v34 = vadd.f32 %v4648_v26, %v164_v31 }
  0xc5   :  { %vm198_vm14 = vcmp.ge.f32.partialorder %v165_v34, 0.0  ;;  %v214_v36 = vmul.f32 0.01, %v165_v34 }
  0xc7   :  { %v230_v38 = vsel %vm198_vm14, %v165_v34, %v214_v36  ;;  %v4703_v39 = vld [vmem:[#allocation2 + $0x38] sm:$0xff] }
  0xc8   :  { %v3986_v40 = vpack.c.bf16 %v230_v38, %v229_v37  ;;  %462 = vmatmul.bf16.gmra.mxu3 %v4703_v39 }
  0xca   :  { %4370 = vst [vmem:[#allocation2 + $0x10] sm:$0xff] %v3986_v40   ;;  %v167_v42 = vpop.f32.mrf.mxu0 }
  0xcb   :  { %v168_v44 = vadd.f32 %v4648_v26, %v167_v42 }
  0xcd   :  { %v215_v48 = vmul.f32 0.01, %v168_v44  ;;  %vm199_vm15 = vcmp.ge.f32.partialorder %v168_v44, 0.0 }
  0xcf   :  { %v231_v53 = vsel %vm199_vm15, %v168_v44, %v215_v48 }
  0xd1   :  { %v3803_v45 = vld [vmem:[#allocation2 + $0x10] sm:$0xff] }
  0xd2   :  { %v170_v46 = vpop.f32.mrf.mxu0  ;;  %442 = vmatmul.bf16.gmra.mxu2 %v3803_v45 }
  0xd3   :  { %v171_v49 = vadd.f32 %v4648_v26, %v170_v46  ;;  %v3816_v26 = vld [vmem:[%s5385_s4] sm:$0xff] }
  0xd4   :  { %539 = vmatpush.bf16.msrb.mxu2 %v3816_v26 }
  0xd5   :  { %vm200_vm0 = vcmp.ge.f32.partialorder %v171_v49, 0.0  ;;  %v216_v52 = vmul.f32 0.01, %v171_v49 }
  0xd7   :  { %v232_v54 = vsel %vm200_vm0, %v171_v49, %v216_v52 }
  0xd8   :  { %v3991_v55 = vpack.c.bf16 %v232_v54, %v231_v53  ;;  %686 = vmatmul.bf16.vlgmr.msra.gmra.mxu3 %v4664_v50 }
  0xda   :  { %4371 = vst [vmem:[#allocation2 + $0x8] sm:$0xff] %v3991_v55  }
  0xe1   :  { %v3804_v57 = vld [vmem:[#allocation2 + $0x8] sm:$0xff] }
  0xe2   :  { %447 = vmatmul.bf16.gmra.mxu2 %v3804_v57 }
  0xe8   :  { %691 = vmatmul.bf16.gmra.mxu3 %v4683_v9 }
  0xf2   :  { %452 = vmatmul.bf16.gmra.mxu2 %v3805_v58 }
  0xf8   :  { %696 = vmatmul.bf16.gmra.mxu3 %v3802_v30 }
 0x102   :  { %540 = vmatmul.bf16.vlgmr.msrb.gmra.mxu2 %v4664_v50 }
 0x108   :  { %701 = vmatmul.bf16.gmra.mxu3 %v3803_v45 }
 0x112   :  { %545 = vmatmul.bf16.gmra.mxu2 %v4683_v9 }
 0x118   :  { %706 = vmatmul.bf16.gmra.mxu3 %v3804_v57 }
 0x122   :  { %550 = vmatmul.bf16.gmra.mxu2 %v3802_v30 }
 0x128   :  { %711 = vmatmul.bf16.gmra.mxu3 %v3805_v58 }
 0x132   :  { %555 = vmatmul.bf16.gmra.mxu2 %v3803_v45 }
 0x138   :  { %716 = vmatmul.bf16.gmra.mxu3 %v4691_v19 }
 0x13b   :  { %v4731_v59 = vpop.f32.mrf.mxu3 }
 0x142   :  { %560 = vmatmul.bf16.gmra.mxu2 %v3804_v57 }
 0x143   :  { %v4733_v60 = vpop.f32.mrf.mxu3 }
 0x145   :  { %v4735_v61 = vpop.f32.mrf.mxu2 }
 0x148   :  { %721 = vmatmul.bf16.gmra.mxu3 %v4703_v39 }
 0x14b   :  { %v4738_v62 = vpop.f32.mrf.mxu3 }
 0x14d   :  { %v4740_v50 = vpop.f32.mrf.mxu2 }
 0x152   :  { %565 = vmatmul.bf16.gmra.mxu2 %v3805_v58 }
 0x153   :  { %v4742_v63 = vpop.f32.mrf.mxu3 }
 0x155   :  { %v4744_v0 = vpop.f32.mrf.mxu2 }
 0x15b   :  { %v687_v1 = vpop.f32.mrf.mxu3 }
 0x15d   :  { %v4746_v2 = vpop.f32.mrf.mxu2 }
 0x162   :  { %570 = vmatmul.bf16.gmra.mxu2 %v4691_v19 }
 0x163   :  { %v689_v3 = vpop.f32.mrf.mxu3 }
 0x164   :  { %v4051_v4 = vpack.c.bf16 %v689_v3, %v687_v1 }
 0x165   :  { %v4749_v5 = vpop.f32.mrf.mxu2 }
 0x166   :  { %4382 = vst [vmem:[#allocation3 + $0x28] sm:$0xff] %v4051_v4  }
 0x16b   :  { %v692_v6 = vpop.f32.mrf.mxu3 }
 0x16d   :  { %v4751_v7 = vpop.f32.mrf.mxu2  ;;  %v3840_v3 = vld [vmem:[#allocation3 + $0x28] sm:$0xff] }
 0x172   :  { %575 = vmatmul.bf16.gmra.mxu2 %v4703_v39 }
 0x173   :  { %v694_v8 = vpop.f32.mrf.mxu3 }
 0x174   :  { %v4056_v9 = vpack.c.bf16 %v694_v8, %v692_v6  ;;  %v3784_v6 = vld [vmem:[%s5387_s1 + $0x4] sm:$0xf]  ;;  %v3147_v8 = vld [vmem:[%s5387_s1 + $0x8] sm:$0xf0] }
 0x175   :  { %v4754_v10 = vpop.f32.mrf.mxu2 }
 0x176   :  { %4383 = vst [vmem:[#allocation3 + $0x40] sm:$0xff] %v4056_v9  }
 0x17b   :  { %v697_v11 = vpop.f32.mrf.mxu3 }
 0x17d   :  { %v4756_v12 = vpop.f32.mrf.mxu2  ;;  %v3841_v1 = vld [vmem:[#allocation3 + $0x40] sm:$0xff] }
 0x183   :  { %v699_v13 = vpop.f32.mrf.mxu3 }
 0x184   :  { %v4061_v14 = vpack.c.bf16 %v699_v13, %v697_v11  ;;  %v4764_v11 = vor.u32 %v3784_v6, %v3147_v8 }
 0x185   :  { %v541_v15 = vpop.f32.mrf.mxu2 }
 0x186   :  { %4384 = vst [vmem:[#allocation3 + $0x38] sm:$0xff] %v4061_v14   ;;  %v3786_v14 = vld [vmem:[%s5387_s1 + $0x14] sm:$0xf] }
 0x18b   :  { %v702_v16 = vpop.f32.mrf.mxu3 }
 0x18d   :  { %v543_v17 = vpop.f32.mrf.mxu2  ;;  %v3842_v57 = vld [vmem:[#allocation3 + $0x38] sm:$0xff] }
 0x18e   :  { %v4011_v18 = vpack.c.bf16 %v543_v17, %v541_v15  ;;  %v3155_v15 = vld [vmem:[%s5387_s1 + $0x18] sm:$0xf0] }
 0x18f   :  { %v4773_v17 = vor.u32 %v3786_v14, %v3155_v15  ;;  %v3879_v14 = vld [vmem:[%s5389_s7 + $0x78] sm:$0xff]  ;;  %v3862_v15 = vld [vmem:[%s5388_s8 + $0x30] sm:$0xff] }
 0x190   :  { %4012 = vst [vmem:[#allocation3] sm:$0xff] %v4011_v18  }
 0x193   :  { %v704_v19 = vpop.f32.mrf.mxu3 }
 0x194   :  { %v4066_v20 = vpack.c.bf16 %v704_v19, %v702_v16 }
 0x195   :  { %v546_v21 = vpop.f32.mrf.mxu2 }
 0x196   :  { %4385 = vst [vmem:[#allocation3 + $0x8] sm:$0xff] %v4066_v20  }
 0x19b   :  { %v707_v22 = vpop.f32.mrf.mxu3 }
 0x19d   :  { %v548_v23 = vpop.f32.mrf.mxu2  ;;  %v3843_v56 = vld [vmem:[#allocation3 + $0x8] sm:$0xff] }
 0x19e   :  { %v4016_v24 = vpack.c.bf16 %v548_v23, %v546_v21  ;;  %v3788_v21 = vld [vmem:[%s5387_s1 + $0x24] sm:$0xf] }
 0x1a0   :  { %4375 = vst [vmem:[#allocation3 + $0x18] sm:$0xff] %v4016_v24  }
 0x1a3   :  { %v709_v25 = vpop.f32.mrf.mxu3 }
 0x1a4   :  { %v4071_v27 = vpack.c.bf16 %v709_v25, %v707_v22  ;;  %v3163_v22 = vld [vmem:[%s5387_s1 + $0x28] sm:$0xf0] }
 0x1a5   :  { %v551_v28 = vpop.f32.mrf.mxu2  ;;  %v4782_v24 = vor.u32 %v3788_v21, %v3163_v22  ;;  %v3797_v21 = vld [vmem:[%s5387_s1 + $0x64] sm:$0xf0] }
 0x1a6   :  { %4386 = vst [vmem:[#allocation3 + $0x58] sm:$0xff] %v4071_v27   ;;  %v3145_v27 = vld [vmem:[%s5387_s1] sm:$0xf] }
 0x1a7   :  { %v3833_v25 = vld [vmem:[#allocation3 + $0x18] sm:$0xff] }
 0x1ab   :  { %v712_v29 = vpop.f32.mrf.mxu3 }
 0x1ad   :  { %v553_v30 = vpop.f32.mrf.mxu2  ;;  %v3844_v54 = vld [vmem:[#allocation3 + $0x58] sm:$0xff] }
 0x1ae   :  { %v4021_v31 = vpack.c.bf16 %v553_v30, %v551_v28  ;;  %v3785_v28 = vld [vmem:[%s5387_s1 + $0x4] sm:$0xf0] }
 0x1af   :  { %v4791_v30 = vor.u32 %v3785_v28, %v3145_v27  ;;  %v3877_v27 = vld [vmem:[%s5389_s7 + $0x68] sm:$0xff] }
 0x1b0   :  { %4376 = vst [vmem:[#allocation3 + $0x50] sm:$0xff] %v4021_v31   ;;  %v3790_v31 = vld [vmem:[%s5387_s1 + $0x34] sm:$0xf] }
 0x1b3   :  { %v714_v32 = vpop.f32.mrf.mxu3 }
 0x1b4   :  { %v4076_v33 = vpack.c.bf16 %v714_v32, %v712_v29  ;;  %v3832_v29 = vld [vmem:[#allocation3] sm:$0xff]  ;;  %v3171_v32 = vld [vmem:[%s5387_s1 + $0x38] sm:$0xf0] }
 0x1b5   :  { %v556_v34 = vpop.f32.mrf.mxu2 }
 0x1b6   :  { %4387 = vst [vmem:[#allocation3 + $0x48] sm:$0xff] %v4076_v33   ;;  %v4800_v33 = vor.u32 %v3790_v31, %v3171_v32  ;;  %v3868_v31 = vld [vmem:[%s5389_s7 + $0x20] sm:$0xff] }
 0x1b7   :  { %v3834_v23 = vld [vmem:[#allocation3 + $0x50] sm:$0xff]  ;;  %v3876_v32 = vld [vmem:[%s5389_s7 + $0x60] sm:$0xff] }
 0x1bb   :  { %v717_v35 = vpop.f32.mrf.mxu3 }
 0x1bd   :  { %v558_v36 = vpop.f32.mrf.mxu2  ;;  %v3845_v53 = vld [vmem:[#allocation3 + $0x48] sm:$0xff] }
 0x1be   :  { %v4026_v37 = vpack.c.bf16 %v558_v36, %v556_v34  ;;  %v3153_v34 = vld [vmem:[%s5387_s1 + $0x10] sm:$0xf] }
 0x1c0   :  { %4377 = vst [vmem:[#allocation3 + $0x60] sm:$0xff] %v4026_v37   ;;  %v3792_v37 = vld [vmem:[%s5387_s1 + $0x44] sm:$0xf] }
 0x1c3   :  { %v719_v38 = vpop.f32.mrf.mxu3 }
 0x1c4   :  { %v4081_v39 = vpack.c.bf16 %v719_v38, %v717_v35  ;;  %v3787_v35 = vld [vmem:[%s5387_s1 + $0x14] sm:$0xf0]  ;;  %v3179_v38 = vld [vmem:[%s5387_s1 + $0x48] sm:$0xf0] }
 0x1c5   :  { %v561_v40 = vpop.f32.mrf.mxu2  ;;  %v4809_v36 = vor.u32 %v3787_v35, %v3153_v34  ;;  %v3859_v34 = vld [vmem:[%s5388_s8 + $0x18] sm:$0xff] }
 0x1c6   :  { %4388 = vst [vmem:[#allocation3 + $0x78] sm:$0xff] %v4081_v39   ;;  %v4818_v39 = vor.u32 %v3792_v37, %v3179_v38  ;;  %v3867_v35 = vld [vmem:[%s5389_s7 + $0x18] sm:$0xff]  ;;  %v3858_v38 = vld [vmem:[%s5388_s8 + $0x10] sm:$0xff] }
 0x1c7   :  { %v3835_v20 = vld [vmem:[#allocation3 + $0x60] sm:$0xff]  ;;  %v3875_v37 = vld [vmem:[%s5389_s7 + $0x58] sm:$0xff] }
 0x1cb   :  { %v722_v41 = vpop.f32.mrf.mxu3 }
 0x1cd   :  { %v563_v42 = vpop.f32.mrf.mxu2  ;;  %v3846_v51 = vld [vmem:[#allocation3 + $0x78] sm:$0xff] }
 0x1ce   :  { %v4031_v43 = vpack.c.bf16 %v563_v42, %v561_v40  ;;  %v3161_v40 = vld [vmem:[%s5387_s1 + $0x20] sm:$0xf] }
 0x1d0   :  { %4378 = vst [vmem:[#allocation3 + $0x68] sm:$0xff] %v4031_v43   ;;  %v3794_v43 = vld [vmem:[%s5387_s1 + $0x54] sm:$0xf] }
 0x1d3   :  { %v724_v44 = vpop.f32.mrf.mxu3 }
 0x1d4   :  { %v4086_v45 = vpack.c.bf16 %v724_v44, %v722_v41  ;;  %v3789_v41 = vld [vmem:[%s5387_s1 + $0x24] sm:$0xf0]  ;;  %v3187_v44 = vld [vmem:[%s5387_s1 + $0x58] sm:$0xf0] }
 0x1d5   :  { %v566_v46 = vpop.f32.mrf.mxu2  ;;  %v4827_v42 = vor.u32 %v3789_v41, %v3161_v40  ;;  %v3866_v40 = vld [vmem:[%s5389_s7 + $0x10] sm:$0xff] }
 0x1d6   :  { %4389 = vst [vmem:[#allocation3 + $0x30] sm:$0xff] %v4086_v45   ;;  %v4836_v45 = vor.u32 %v3794_v43, %v3187_v44  ;;  %v3874_v41 = vld [vmem:[%s5389_s7 + $0x50] sm:$0xff]  ;;  %v3799_v44 = vld [vmem:[%s5387_s1 + $0x74] sm:$0xf0] }
 0x1d7   :  { %v3836_v19 = vld [vmem:[#allocation3 + $0x68] sm:$0xff]  ;;  %v3201_v43 = vld [vmem:[%s5387_s1 + $0x70] sm:$0xf] }
 0x1dd   :  { %v568_v47 = vpop.f32.mrf.mxu2  ;;  %v3847_v48 = vld [vmem:[#allocation3 + $0x30] sm:$0xff] }
 0x1de   :  { %v4036_v49 = vpack.c.bf16 %v568_v47, %v566_v46  ;;  %1016 = vmatpush.bf16.msrb.mxu1 %v3847_v48  ;;  %v3169_v46 = vld [vmem:[%s5387_s1 + $0x30] sm:$0xf]  ;;  %v3791_v47 = vld [vmem:[%s5387_s1 + $0x34] sm:$0xf0] }
 0x1df   :  { %v4845_v48 = vor.u32 %v3791_v47, %v3169_v46  ;;  %v4961_v47 = vor.u32 %v3799_v44, %v3201_v43 }
 0x1e0   :  { %4379 = vst [vmem:[#allocation3 + $0x20] sm:$0xff] %v4036_v49   ;;  %v3796_v49 = vld [vmem:[%s5387_s1 + $0x64] sm:$0xf] }
 0x1e2   :  { %1017 = vmatpush.bf16.msrb.mxu1 %v3846_v51  ;;  %v3195_v51 = vld [vmem:[%s5387_s1 + $0x68] sm:$0xf0] }
 0x1e5   :  { %v571_v52 = vpop.f32.mrf.mxu2 }
 0x1e6   :  { %1018 = vmatpush.bf16.msrb.mxu1 %v3845_v53  ;;  %v4857_v53 = vpop.f32.mrf.mxu1 }
 0x1e7   :  { %v3837_v18 = vld [vmem:[#allocation3 + $0x20] sm:$0xff] }
 0x1ea   :  { %1019 = vmatpush.bf16.msrb.mxu1 %v3844_v54  ;;  %v3177_v54 = vld [vmem:[%s5387_s1 + $0x40] sm:$0xf] }
 0x1ed   :  { %v573_v55 = vpop.f32.mrf.mxu2 }
 0x1ee   :  { %v4041_v26 = vpack.c.bf16 %v573_v55, %v571_v52  ;;  %1020 = vmatpush.bf16.msrb.mxu1 %v3843_v56  ;;  %v4854_v52 = vor.u32 %v3796_v49, %v3195_v51  ;;  %v3793_v55 = vld [vmem:[%s5387_s1 + $0x44] sm:$0xf0] }
 0x1ef   :  { %v4865_v56 = vor.u32 %v3793_v55, %v3177_v54  ;;  %v3857_v49 = vld [vmem:[%s5388_s8 + $0x8] sm:$0xff]  ;;  %v3856_v55 = vld [vmem:[%s5388_s8] sm:$0xff] }
 0x1f0   :  { %4380 = vst [vmem:[#allocation3 + $0x70] sm:$0xff] %v4041_v26   ;;  %v3798_v26 = vld [vmem:[%s5387_s1 + $0x74] sm:$0xf]  ;;  %v3865_v51 = vld [vmem:[%s5389_s7 + $0x8] sm:$0xff] }
 0x1f1   :  { %v3873_v54 = vld [vmem:[%s5389_s7 + $0x48] sm:$0xff] }
 0x1f2   :  { %1021 = vmatpush.bf16.msrb.mxu1 %v3842_v57  ;;  %v3203_v57 = vld [vmem:[%s5387_s1 + $0x78] sm:$0xf0] }
 0x1f5   :  { %v576_v58 = vpop.f32.mrf.mxu2 }
 0x1f6   :  { %1022 = vmatpush.bf16.msrb.mxu1 %v3841_v1  ;;  %v4876_v1 = vor.u32 %v3798_v26, %v3203_v57  ;;  %v3864_v26 = vld [vmem:[%s5389_s7] sm:$0xff] }
 0x1f7   :  { %v3838_v16 = vld [vmem:[#allocation3 + $0x70] sm:$0xff]  ;;  %v3872_v57 = vld [vmem:[%s5389_s7 + $0x40] sm:$0xff] }
 0x1fa   :  { %1023 = vmatpush.bf16.msrb.mxu1 %v3840_v3  ;;  %v3185_v3 = vld [vmem:[%s5387_s1 + $0x50] sm:$0xf] }
 0x1fd   :  { %v578_v4 = vpop.f32.mrf.mxu2  ;;  %1024 = vmatmul.bf16.vlgmr.msrb.gmra.mxu1 %v4764_v11 }
 0x1fe   :  { %v4046_v9 = vpack.c.bf16 %v578_v4, %v576_v58  ;;  %v4874_v58 = vpop.f32.mrf.mxu1  ;;  %v3795_v4 = vld [vmem:[%s5387_s1 + $0x54] sm:$0xf0] }
 0x1ff   :  { %v4885_v6 = vor.u32 %v3795_v4, %v3185_v3 }
 0x200   :  { %4381 = vst [vmem:[#allocation3 + $0x10] sm:$0xff] %v4046_v9   ;;  %v3863_v9 = vld [vmem:[%s5388_s8 + $0x38] sm:$0xff] }
 0x201   :  { %1245 = vmatpush.bf16.msra.mxu2 %v3863_v9 }
 0x205   :  { %1246 = vmatpush.bf16.msra.mxu2 %v3862_v15 }
 0x206   :  { %v4887_v8 = vpop.f32.mrf.mxu1 }
 0x207   :  { %v3839_v13 = vld [vmem:[#allocation3 + $0x10] sm:$0xff] }
 0x208   :  { %967 = vmatpush.bf16.msrb.mxu0 %v3839_v13  ;;  %v3871_v13 = vld [vmem:[%s5389_s7 + $0x38] sm:$0xff] }
 0x209   :  { %1358 = vmatpush.bf16.msrb.mxu3 %v3871_v13  ;;  %v4985_v13 = vld [vmem:[%s5386_s6] ss:$0 sm:$0xff] }
 0x20c   :  { %968 = vmatpush.bf16.msrb.mxu0 %v3838_v16  ;;  %v3870_v16 = vld [vmem:[%s5389_s7 + $0x30] sm:$0xff] }
 0x20d   :  { %1029 = vmatmul.bf16.gmra.mxu1 %v4773_v17  ;;  %1359 = vmatpush.bf16.msrb.mxu3 %v3870_v16  ;;  %v429_v16 = vadd.f32 %v4985_v13, %v4857_v53 }
 0x210   :  { %969 = vmatpush.bf16.msrb.mxu0 %v3837_v18  ;;  %v3878_v18 = vld [vmem:[%s5389_s7 + $0x70] sm:$0xff] }
 0x214   :  { %970 = vmatpush.bf16.msrb.mxu0 %v3836_v19  ;;  %v4908_v19 = vpop.f32.mrf.mxu1 }
 0x215   :  { %v436_v53 = vadd.f32 %v4985_v13, %v4908_v19  ;;  %v441_v19 = vadd.f32 %v4985_v13, %v4740_v50 }
 0x218   :  { %971 = vmatpush.bf16.msrb.mxu0 %v3835_v20  ;;  %v3193_v20 = vld [vmem:[%s5387_s1 + $0x60] sm:$0xf] }
 0x219   :  { %v4916_v22 = vor.u32 %v3797_v21, %v3193_v20 }
 0x21c   :  { %972 = vmatpush.bf16.msrb.mxu0 %v3834_v23  ;;  %v3861_v23 = vld [vmem:[%s5388_s8 + $0x28] sm:$0xff] }
 0x21d   :  { %1034 = vmatmul.bf16.gmra.mxu1 %v4782_v24  ;;  %1247 = vmatpush.bf16.msra.mxu2 %v3861_v23 }
 0x220   :  { %973 = vmatpush.bf16.msrb.mxu0 %v3833_v25  ;;  %v3869_v25 = vld [vmem:[%s5389_s7 + $0x28] sm:$0xff] }
 0x221   :  { %1360 = vmatpush.bf16.msrb.mxu3 %v3869_v25 }
 0x224   :  { %974 = vmatpush.bf16.msrb.mxu0 %v3832_v29  ;;  %v3860_v29 = vld [vmem:[%s5388_s8 + $0x20] sm:$0xff] }
 0x225   :  { %1248 = vmatpush.bf16.msra.mxu2 %v3860_v29  ;;  %1361 = vmatpush.bf16.msrb.mxu3 %v3868_v31 }
 0x227   :  { %975 = vmatmul.bf16.vlgmr.msrb.gmra.mxu0 %v4791_v30 }
 0x228   :  { %1504 = vmatpush.bf16.msra.mxu0 %v3879_v14 }
 0x229   :  { %1249 = vmatpush.bf16.msra.mxu2 %v3859_v34  ;;  %1362 = vmatpush.bf16.msrb.mxu3 %v3867_v35 }
 0x22c   :  { %1505 = vmatpush.bf16.msra.mxu0 %v3878_v18  ;;  %v431_v18 = vadd.f32 %v4985_v13, %v4874_v58 }
 0x22d   :  { %1039 = vmatmul.bf16.gmra.mxu1 %v4800_v33  ;;  %1250 = vmatpush.bf16.msra.mxu2 %v3858_v38 }
 0x22e   :  { %1363 = vmatpush.bf16.msrb.mxu3 %v3866_v40 }
 0x230   :  { %1506 = vmatpush.bf16.msra.mxu0 %v3877_v27 }
 0x231   :  { %1251 = vmatpush.bf16.msra.mxu2 %v3857_v49 }
 0x232   :  { %1364 = vmatpush.bf16.msrb.mxu3 %v3865_v51 }
 0x234   :  { %1507 = vmatpush.bf16.msra.mxu0 %v3876_v32 }
 0x235   :  { %1252 = vmatpush.bf16.msra.mxu2 %v3856_v55 }
 0x236   :  { %1365 = vmatpush.bf16.msrb.mxu3 %v3864_v26 }
 0x237   :  { %980 = vmatmul.bf16.gmra.mxu0 %v4809_v36 }
 0x238   :  { %1508 = vmatpush.bf16.msra.mxu0 %v3875_v37 }
 0x23c   :  { %1509 = vmatpush.bf16.msra.mxu0 %v3874_v41 }
 0x23d   :  { %1044 = vmatmul.bf16.gmra.mxu1 %v4818_v39 }
 0x240   :  { %1510 = vmatpush.bf16.msra.mxu0 %v3873_v54 }
 0x244   :  { %1511 = vmatpush.bf16.msra.mxu0 %v3872_v57 }
 0x247   :  { %985 = vmatmul.bf16.gmra.mxu0 %v4827_v42 }
 0x24d   :  { %1049 = vmatmul.bf16.gmra.mxu1 %v4836_v45 }
 0x257   :  { %990 = vmatmul.bf16.gmra.mxu0 %v4845_v48 }
 0x25d   :  { %1054 = vmatmul.bf16.gmra.mxu1 %v4854_v52 }
 0x267   :  { %995 = vmatmul.bf16.gmra.mxu0 %v4865_v56 }
 0x26d   :  { %1059 = vmatmul.bf16.gmra.mxu1 %v4876_v1 }
 0x277   :  { %1000 = vmatmul.bf16.gmra.mxu0 %v4885_v6 }
 0x27a   :  { %v1025_v28 = vpop.f32.mrf.mxu1 }
 0x282   :  { %v1027_v46 = vpop.f32.mrf.mxu1 }
 0x287   :  { %1005 = vmatmul.bf16.gmra.mxu0 %v4916_v22 }
 0x28a   :  { %v1030_v3 = vpop.f32.mrf.mxu1 }
 0x292   :  { %v1032_v9 = vpop.f32.mrf.mxu1 }
 0x297   :  { %1010 = vmatmul.bf16.gmra.mxu0 %v4961_v47 }
 0x29a   :  { %v1035_v21 = vpop.f32.mrf.mxu1 }
 0x2a2   :  { %v1037_v31 = vpop.f32.mrf.mxu1 }
 0x2a4   :  { %v976_v4 = vpop.f32.mrf.mxu0 }
 0x2a5   :  { %v1026_v14 = vadd.f32 %v1025_v28, %v976_v4  ;;  %v434_v28 = vadd.f32 %v4985_v13, %v4887_v8  ;;  %v439_v8 = vadd.f32 %v4985_v13, %v4735_v61  ;;  %v446_v61 = vadd.f32 %v4985_v13, %v4746_v2 }
 0x2a6   :  { %v451_v2 = vadd.f32 %v4985_v13, %v4751_v7 }
 0x2a7   :  { %v1065_v23 = vadd.f32 %v1026_v14, %v429_v16  ;;  %v444_v16 = vadd.f32 %v4985_v13, %v4744_v0  ;;  %v449_v0 = vadd.f32 %v4985_v13, %v4749_v5  ;;  %v456_v5 = vadd.f32 %v4985_v13, %v4756_v12 }
 0x2a8   :  { %v461_v12 = vadd.f32 %v4985_v13, %v4733_v60  ;;  %v466_v60 = vadd.f32 %v4985_v13, %v4742_v63 }
 0x2aa   :  { %v1040_v41 = vpop.f32.mrf.mxu1 }
 0x2ac   :  { %v978_v15 = vpop.f32.mrf.mxu0 }
 0x2ad   :  { %v1028_v20 = vadd.f32 %v1027_v46, %v978_v15 }
 0x2af   :  { %v1066_v25 = vadd.f32 %v1028_v20, %v431_v18 }
 0x2b1   :  { %v4091_v27 = vpack.c.bf16 %v1066_v25, %v1065_v23 }
 0x2b2   :  { %v1042_v51 = vpop.f32.mrf.mxu1 }
 0x2b3   :  { %4092 = vst [vmem:[#allocation2 + $0x30] sm:$0xff] %v4091_v27  }
 0x2b4   :  { %v981_v29 = vpop.f32.mrf.mxu0 }
 0x2b5   :  { %v1031_v34 = vadd.f32 %v1030_v3, %v981_v29 }
 0x2b7   :  { %v1067_v37 = vadd.f32 %v1031_v34, %v434_v28 }
 0x2ba   :  { %v3848_v32 = vld [vmem:[#allocation2 + $0x30] sm:$0xff]  ;;  %v1045_v4 = vpop.f32.mrf.mxu1 }
 0x2bb   :  { %1253 = vmatmul.bf16.vlgmr.msra.gmra.mxu2 %v3848_v32  ;;  %1366 = vmatmul.bf16.vlgmr.msrb.gmra.mxu3 %v3848_v32 }
 0x2bc   :  { %v983_v35 = vpop.f32.mrf.mxu0  ;;  %1512 = vmatmul.bf16.vlgmr.msra.gmra.mxu0 %v3848_v32 }
 0x2bd   :  { %v1033_v58 = vadd.f32 %v1032_v9, %v983_v35 }
 0x2bf   :  { %v1068_v38 = vadd.f32 %v1033_v58, %v436_v53 }
 0x2c1   :  { %v4096_v40 = vpack.c.bf16 %v1068_v38, %v1067_v37 }
 0x2c3   :  { %4390 = vst [vmem:[#allocation2] sm:$0xff] %v4096_v40  }
 0x2c4   :  { %v986_v43 = vpop.f32.mrf.mxu0 }
 0x2c5   :  { %v1036_v46 = vadd.f32 %v1035_v21, %v986_v43  ;;  %v1047_v21 = vpop.f32.mrf.mxu1  ;;  %v454_v43 = vadd.f32 %v4985_v13, %v4754_v10  ;;  %v459_v10 = vadd.f32 %v4985_v13, %v4731_v59  ;;  %v464_v59 = vadd.f32 %v4985_v13, %v4738_v62 }
 0x2c7   :  { %v1069_v55 = vadd.f32 %v1036_v46, %v439_v8 }
 0x2ca   :  { %v3849_v44 = vld [vmem:[#allocation2] sm:$0xff] }
 0x2cb   :  { %1258 = vmatmul.bf16.gmra.mxu2 %v3849_v44  ;;  %1371 = vmatmul.bf16.gmra.mxu3 %v3849_v44 }
 0x2cc   :  { %v988_v49 = vpop.f32.mrf.mxu0  ;;  %1517 = vmatmul.bf16.gmra.mxu0 %v3849_v44 }
 0x2cd   :  { %v1038_v54 = vadd.f32 %v1037_v31, %v988_v49  ;;  %v1050_v27 = vpop.f32.mrf.mxu1 }
 0x2cf   :  { %v1070_v26 = vadd.f32 %v1038_v54, %v441_v19 }
 0x2d1   :  { %v4101_v57 = vpack.c.bf16 %v1070_v26, %v1069_v55 }
 0x2d3   :  { %4391 = vst [vmem:[#allocation2 + $0x18] sm:$0xff] %v4101_v57  }
 0x2d4   :  { %v991_v3 = vpop.f32.mrf.mxu0 }
 0x2d5   :  { %v1041_v14 = vadd.f32 %v1040_v41, %v991_v3  ;;  %v1052_v37 = vpop.f32.mrf.mxu1 }
 0x2d7   :  { %v1071_v18 = vadd.f32 %v1041_v14, %v444_v16 }
 0x2da   :  { %v3850_v9 = vld [vmem:[#allocation2 + $0x18] sm:$0xff] }
 0x2db   :  { %1263 = vmatmul.bf16.gmra.mxu2 %v3850_v9  ;;  %1376 = vmatmul.bf16.gmra.mxu3 %v3850_v9 }
 0x2dc   :  { %v993_v15 = vpop.f32.mrf.mxu0  ;;  %1522 = vmatmul.bf16.gmra.mxu0 %v3850_v9 }
 0x2dd   :  { %v1043_v50 = vadd.f32 %v1042_v51, %v993_v15  ;;  %v1055_v44 = vpop.f32.mrf.mxu1 }
 0x2df   :  { %v1072_v20 = vadd.f32 %v1043_v50, %v446_v61 }
 0x2e1   :  { %v4106_v23 = vpack.c.bf16 %v1072_v20, %v1071_v18 }
 0x2e3   :  { %4392 = vst [vmem:[#allocation2 + $0x10] sm:$0xff] %v4106_v23  }
 0x2e4   :  { %v996_v25 = vpop.f32.mrf.mxu0 }
 0x2e5   :  { %v1046_v31 = vadd.f32 %v1045_v4, %v996_v25  ;;  %v1057_v19 = vpop.f32.mrf.mxu1 }
 0x2e7   :  { %v1073_v35 = vadd.f32 %v1046_v31, %v449_v0 }
 0x2ea   :  { %v3851_v29 = vld [vmem:[#allocation2 + $0x10] sm:$0xff] }
 0x2eb   :  { %1268 = vmatmul.bf16.gmra.mxu2 %v3851_v29  ;;  %1381 = vmatmul.bf16.gmra.mxu3 %v3851_v29 }
 0x2ec   :  { %v998_v32 = vpop.f32.mrf.mxu0  ;;  %1527 = vmatmul.bf16.gmra.mxu0 %v3851_v29 }
 0x2ed   :  { %v1048_v34 = vadd.f32 %v1047_v21, %v998_v32  ;;  %v1060_v14 = vpop.f32.mrf.mxu1 }
 0x2ef   :  { %v1074_v28 = vadd.f32 %v1048_v34, %v451_v2 }
 0x2f1   :  { %v4111_v53 = vpack.c.bf16 %v1074_v28, %v1073_v35 }
 0x2f3   :  { %4393 = vst [vmem:[#allocation2 + $0x8] sm:$0xff] %v4111_v53  }
 0x2f4   :  { %v1001_v58 = vpop.f32.mrf.mxu0 }
 0x2f5   :  { %v1051_v40 = vadd.f32 %v1050_v27, %v1001_v58  ;;  %v1062_v50 = vpop.f32.mrf.mxu1 }
 0x2f7   :  { %v1075_v46 = vadd.f32 %v1051_v40, %v454_v43 }
 0x2fa   :  { %v3852_v38 = vld [vmem:[#allocation2 + $0x8] sm:$0xff] }
 0x2fb   :  { %1273 = vmatmul.bf16.gmra.mxu2 %v3852_v38  ;;  %1386 = vmatmul.bf16.gmra.mxu3 %v3852_v38 }
 0x2fc   :  { %v1003_v41 = vpop.f32.mrf.mxu0  ;;  %1532 = vmatmul.bf16.gmra.mxu0 %v3852_v38 }
 0x2fd   :  { %v1053_v7 = vadd.f32 %v1052_v37, %v1003_v41 }
 0x2ff   :  { %v1076_v49 = vadd.f32 %v1053_v7, %v456_v5 }
 0x301   :  { %v4116_v51 = vpack.c.bf16 %v1076_v49, %v1075_v46 }
 0x303   :  { %4394 = vst [vmem:[#allocation2 + $0x20] sm:$0xff] %v4116_v51  }
 0x304   :  { %v1006_v8 = vpop.f32.mrf.mxu0 }
 0x305   :  { %v1056_v55 = vadd.f32 %v1055_v44, %v1006_v8 }
 0x307   :  { %v1077_v3 = vadd.f32 %v1056_v55, %v459_v10 }
 0x30a   :  { %v3853_v54 = vld [vmem:[#allocation2 + $0x20] sm:$0xff] }
 0x30b   :  { %1278 = vmatmul.bf16.gmra.mxu2 %v3853_v54  ;;  %1391 = vmatmul.bf16.gmra.mxu3 %v3853_v54 }
 0x30c   :  { %v1008_v26 = vpop.f32.mrf.mxu0  ;;  %1537 = vmatmul.bf16.gmra.mxu0 %v3853_v54 }
 0x30d   :  { %v1058_v57 = vadd.f32 %v1057_v19, %v1008_v26 }
 0x30f   :  { %v1078_v4 = vadd.f32 %v1058_v57, %v461_v12 }
 0x311   :  { %v4121_v9 = vpack.c.bf16 %v1078_v4, %v1077_v3 }
 0x313   :  { %4395 = vst [vmem:[#allocation2 + $0x28] sm:$0xff] %v4121_v9  }
 0x314   :  { %v1011_v15 = vpop.f32.mrf.mxu0 }
 0x315   :  { %v1061_v61 = vadd.f32 %v1060_v14, %v1011_v15 }
 0x317   :  { %v1079_v21 = vadd.f32 %v1061_v61, %v464_v59 }
 0x31a   :  { %v3854_v16 = vld [vmem:[#allocation2 + $0x28] sm:$0xff] }
 0x31b   :  { %1283 = vmatmul.bf16.gmra.mxu2 %v3854_v16  ;;  %1396 = vmatmul.bf16.gmra.mxu3 %v3854_v16 }
 0x31c   :  { %v1013_v18 = vpop.f32.mrf.mxu0  ;;  %1542 = vmatmul.bf16.gmra.mxu0 %v3854_v16 }
 0x31d   :  { %v1063_v20 = vadd.f32 %v1062_v50, %v1013_v18 }
 0x31f   :  { %v1080_v23 = vadd.f32 %v1063_v20, %v466_v60 }
 0x321   :  { %v4126_v25 = vpack.c.bf16 %v1080_v23, %v1079_v21 }
 0x323   :  { %4396 = vst [vmem:[#allocation2 + $0x38] sm:$0xff] %v4126_v25  }
 0x32a   :  { %v3855_v27 = vld [vmem:[#allocation2 + $0x38] sm:$0xff] }
 0x32b   :  { %1288 = vmatmul.bf16.gmra.mxu2 %v3855_v27  ;;  %1401 = vmatmul.bf16.gmra.mxu3 %v3855_v27 }
 0x32c   :  { %1547 = vmatmul.bf16.gmra.mxu0 %v3855_v27 }
 0x339   :  { %v1513_v29 = vpop.f32.mrf.mxu0 }
 0x33e   :  { %v1367_v31 = vpop.f32.mrf.mxu3 }
 0x341   :  { %v1515_v32 = vpop.f32.mrf.mxu0 }
 0x342   :  { %v4171_v0 = vpack.c.bf16 %v1515_v32, %v1513_v29 }
 0x344   :  { %4404 = vst [vmem:[#allocation3 + $0x28] sm:$0xff] %v4171_v0   ;;  %v5019_v0 = vpop.f32.mrf.mxu2 }
 0x346   :  { %v1369_v2 = vpop.f32.mrf.mxu3 }
 0x347   :  { %v4131_v62 = vpack.c.bf16 %v1369_v2, %v1367_v31 }
 0x349   :  { %4132 = vst [vmem:[#allocation3] sm:$0xff] %v4131_v62   ;;  %v1518_v34 = vpop.f32.mrf.mxu0 }
 0x34e   :  { %v1372_v63 = vpop.f32.mrf.mxu3 }
 0x351   :  { %v1520_v13 = vpop.f32.mrf.mxu0 }
 0x352   :  { %v4176_v35 = vpack.c.bf16 %v1520_v13, %v1518_v34  ;;  %v5021_v13 = vpop.f32.mrf.mxu2 }
 0x354   :  { %4405 = vst [vmem:[#allocation3 + $0x40] sm:$0xff] %v4176_v35  }
 0x356   :  { %v1374_v28 = vpop.f32.mrf.mxu3 }
 0x357   :  { %v4136_v53 = vpack.c.bf16 %v1374_v28, %v1372_v63 }
 0x359   :  { %4397 = vst [vmem:[#allocation3 + $0x18] sm:$0xff] %v4136_v53   ;;  %v1523_v58 = vpop.f32.mrf.mxu0 }
 0x35e   :  { %v1377_v37 = vpop.f32.mrf.mxu3 }
 0x361   :  { %v1525_v38 = vpop.f32.mrf.mxu0 }
 0x362   :  { %v4181_v40 = vpack.c.bf16 %v1525_v38, %v1523_v58 }
 0x364   :  { %4406 = vst [vmem:[#allocation3 + $0x38] sm:$0xff] %v4181_v40   ;;  %v5023_v40 = vpop.f32.mrf.mxu2 }
 0x366   :  { %v1379_v41 = vpop.f32.mrf.mxu3 }
 0x367   :  { %v4141_v43 = vpack.c.bf16 %v1379_v41, %v1377_v37  ;;  %v3889_v37 = vld [vmem:[#allocation3 + $0x40] sm:$0xff]  ;;  %v3888_v41 = vld [vmem:[#allocation3 + $0x28] sm:$0xff] }
 0x369   :  { %4398 = vst [vmem:[#allocation3 + $0x50] sm:$0xff] %v4141_v43   ;;  %v1528_v5 = vpop.f32.mrf.mxu0  ;;  %v3881_v43 = vld [vmem:[#allocation3 + $0x18] sm:$0xff] }
 0x36b   :  { %v3890_v53 = vld [vmem:[#allocation3 + $0x38] sm:$0xff] }
 0x36e   :  { %v1382_v7 = vpop.f32.mrf.mxu3 }
 0x370   :  { %v3882_v38 = vld [vmem:[#allocation3 + $0x50] sm:$0xff] }
 0x371   :  { %v1530_v44 = vpop.f32.mrf.mxu0 }
 0x372   :  { %v4186_v46 = vpack.c.bf16 %v1530_v44, %v1528_v5  ;;  %v3880_v5 = vld [vmem:[#allocation3] sm:$0xff] }
 0x374   :  { %4407 = vst [vmem:[#allocation3 + $0x8] sm:$0xff] %v4186_v46  }
 0x376   :  { %v1384_v49 = vpop.f32.mrf.mxu3 }
 0x377   :  { %v4146_v51 = vpack.c.bf16 %v1384_v49, %v1382_v7  ;;  %v5026_v7 = vpop.f32.mrf.mxu2 }
 0x379   :  { %4399 = vst [vmem:[#allocation3 + $0x60] sm:$0xff] %v4146_v51   ;;  %v1533_v8 = vpop.f32.mrf.mxu0 }
 0x37b   :  { %v3891_v35 = vld [vmem:[#allocation3 + $0x8] sm:$0xff] }
 0x37e   :  { %v1387_v19 = vpop.f32.mrf.mxu3 }
 0x37f   :  { %v5029_v44 = vpop.f32.mrf.mxu2 }
 0x380   :  { %v3883_v58 = vld [vmem:[#allocation3 + $0x60] sm:$0xff] }
 0x381   :  { %v1535_v54 = vpop.f32.mrf.mxu0 }
 0x382   :  { %v4191_v55 = vpack.c.bf16 %v1535_v54, %v1533_v8 }
 0x384   :  { %4408 = vst [vmem:[#allocation3 + $0x58] sm:$0xff] %v4191_v55  }
 0x386   :  { %v1389_v26 = vpop.f32.mrf.mxu3 }
 0x387   :  { %v4151_v10 = vpack.c.bf16 %v1389_v26, %v1387_v19  ;;  %v5033_v46 = vpop.f32.mrf.mxu2  ;;  %v3911_v26 = vld [vmem:[%s5391_s11 + $0x38] sm:$0xff] }
 0x388   :  { %1991 = vmatpush.bf16.msra.mxu3 %v3911_v26 }
 0x389   :  { %4400 = vst [vmem:[#allocation3 + $0x68] sm:$0xff] %v4151_v10   ;;  %v1538_v12 = vpop.f32.mrf.mxu0  ;;  %v3919_v10 = vld [vmem:[%s5392_s10 + $0x38] sm:$0xff] }
 0x38a   :  { %2104 = vmatpush.bf16.msrb.mxu0 %v3919_v10 }
 0x38b   :  { %v3892_v34 = vld [vmem:[#allocation3 + $0x58] sm:$0xff] }
 0x38e   :  { %v1392_v57 = vpop.f32.mrf.mxu3 }
 0x38f   :  { %v5036_v49 = vpop.f32.mrf.mxu2 }
 0x390   :  { %v3884_v28 = vld [vmem:[#allocation3 + $0x68] sm:$0xff] }
 0x391   :  { %v1540_v3 = vpop.f32.mrf.mxu0 }
 0x392   :  { %v4196_v4 = vpack.c.bf16 %v1540_v3, %v1538_v12  ;;  %v3927_v12 = vld [vmem:[%s5392_s10 + $0x78] sm:$0xff]  ;;  %v3918_v3 = vld [vmem:[%s5392_s10 + $0x30] sm:$0xff] }
 0x393   :  { %2105 = vmatpush.bf16.msrb.mxu0 %v3918_v3 }
 0x394   :  { %4409 = vst [vmem:[#allocation3 + $0x48] sm:$0xff] %v4196_v4   ;;  %v3926_v4 = vld [vmem:[%s5392_s10 + $0x70] sm:$0xff] }
 0x396   :  { %v1394_v9 = vpop.f32.mrf.mxu3 }
 0x397   :  { %v4156_v14 = vpack.c.bf16 %v1394_v9, %v1392_v57  ;;  %v5039_v51 = vpop.f32.mrf.mxu2  ;;  %v3910_v57 = vld [vmem:[%s5391_s11 + $0x30] sm:$0xff] }
 0x398   :  { %1992 = vmatpush.bf16.msra.mxu3 %v3910_v57 }
 0x399   :  { %4401 = vst [vmem:[#allocation3 + $0x20] sm:$0xff] %v4156_v14   ;;  %v1543_v15 = vpop.f32.mrf.mxu0  ;;  %v3909_v14 = vld [vmem:[%s5391_s11 + $0x28] sm:$0xff] }
 0x39b   :  { %v3893_v2 = vld [vmem:[#allocation3 + $0x48] sm:$0xff] }
 0x39c   :  { %1993 = vmatpush.bf16.msra.mxu3 %v3909_v14 }
 0x39e   :  { %v1397_v16 = vpop.f32.mrf.mxu3 }
 0x39f   :  { %v5042_v8 = vpop.f32.mrf.mxu2 }
 0x3a0   :  { %v3885_v63 = vld [vmem:[#allocation3 + $0x20] sm:$0xff] }
 0x3a1   :  { %v1545_v61 = vpop.f32.mrf.mxu0 }
 0x3a2   :  { %v4201_v50 = vpack.c.bf16 %v1545_v61, %v1543_v15  ;;  %v3917_v15 = vld [vmem:[%s5392_s10 + $0x28] sm:$0xff]  ;;  %v3908_v61 = vld [vmem:[%s5391_s11 + $0x20] sm:$0xff] }
 0x3a3   :  { %2106 = vmatpush.bf16.msrb.mxu0 %v3917_v15  ;;  %1994 = vmatpush.bf16.msra.mxu3 %v3908_v61 }
 0x3a4   :  { %4410 = vst [vmem:[#allocation3 + $0x78] sm:$0xff] %v4201_v50   ;;  %v3916_v50 = vld [vmem:[%s5392_s10 + $0x20] sm:$0xff] }
 0x3a6   :  { %v1399_v18 = vpop.f32.mrf.mxu3 }
 0x3a7   :  { %v4161_v59 = vpack.c.bf16 %v1399_v18, %v1397_v16  ;;  %v5045_v19 = vpop.f32.mrf.mxu2  ;;  %v3925_v16 = vld [vmem:[%s5392_s10 + $0x68] sm:$0xff]  ;;  %v3924_v18 = vld [vmem:[%s5392_s10 + $0x60] sm:$0xff]  ;;  %2107 = vmatpush.bf16.msrb.mxu0 %v3916_v50 }
 0x3a9   :  { %4402 = vst [vmem:[#allocation3 + $0x70] sm:$0xff] %v4161_v59   ;;  %v1548_v60 = vpop.f32.mrf.mxu0 }
 0x3ab   :  { %v3894_v31 = vld [vmem:[#allocation3 + $0x78] sm:$0xff] }
 0x3ae   :  { %v1402_v20 = vpop.f32.mrf.mxu3 }
 0x3af   :  { %v5049_v54 = vpop.f32.mrf.mxu2 }
 0x3b0   :  { %v3886_v62 = vld [vmem:[#allocation3 + $0x70] sm:$0xff] }
 0x3b1   :  { %v1550_v21 = vpop.f32.mrf.mxu0 }
 0x3b2   :  { %v4206_v23 = vpack.c.bf16 %v1550_v21, %v1548_v60  ;;  %v3907_v60 = vld [vmem:[%s5391_s11 + $0x18] sm:$0xff] }
 0x3b3   :  { %v3923_v21 = vld [vmem:[%s5392_s10 + $0x58] sm:$0xff]  ;;  %1995 = vmatpush.bf16.msra.mxu3 %v3907_v60 }
 0x3b4   :  { %4411 = vst [vmem:[#allocation3 + $0x30] sm:$0xff] %v4206_v23   ;;  %v3906_v23 = vld [vmem:[%s5391_s11 + $0x10] sm:$0xff] }
 0x3b6   :  { %v1404_v25 = vpop.f32.mrf.mxu3 }
 0x3b7   :  { %v4166_v27 = vpack.c.bf16 %v1404_v25, %v1402_v20  ;;  %v5052_v55 = vpop.f32.mrf.mxu2  ;;  %v3915_v20 = vld [vmem:[%s5392_s10 + $0x18] sm:$0xff]  ;;  %v3914_v25 = vld [vmem:[%s5392_s10 + $0x10] sm:$0xff]  ;;  %1996 = vmatpush.bf16.msra.mxu3 %v3906_v23 }
 0x3b8   :  { %2108 = vmatpush.bf16.msrb.mxu0 %v3915_v20 }
 0x3b9   :  { %4403 = vst [vmem:[#allocation3 + $0x10] sm:$0xff] %v4166_v27   ;;  %v3922_v27 = vld [vmem:[%s5392_s10 + $0x50] sm:$0xff] }
 0x3bb   :  { %v3895_v29 = vld [vmem:[#allocation3 + $0x30] sm:$0xff] }
 0x3bc   :  { %1762 = vmatpush.bf16.msrb.mxu2 %v3895_v29  ;;  %2109 = vmatpush.bf16.msrb.mxu0 %v3914_v25 }
 0x3bf   :  { %v5073_v9 = vpop.f32.mrf.mxu2 }
 0x3c0   :  { %v3887_v32 = vld [vmem:[#allocation3 + $0x10] sm:$0xff]  ;;  %1763 = vmatpush.bf16.msrb.mxu2 %v3894_v31  ;;  %v3905_v31 = vld [vmem:[%s5391_s11 + $0x8] sm:$0xff] }
 0x3c1   :  { %1713 = vmatpush.bf16.msra.mxu1 %v3887_v32  ;;  %v3913_v32 = vld [vmem:[%s5392_s10 + $0x8] sm:$0xff]  ;;  %1997 = vmatpush.bf16.msra.mxu3 %v3905_v31 }
 0x3c2   :  { %2110 = vmatpush.bf16.msrb.mxu0 %v3913_v32 }
 0x3c4   :  { %1764 = vmatpush.bf16.msrb.mxu2 %v3893_v2  ;;  %v3921_v2 = vld [vmem:[%s5392_s10 + $0x48] sm:$0xff] }
 0x3c5   :  { %1714 = vmatpush.bf16.msra.mxu1 %v3886_v62  ;;  %v3904_v62 = vld [vmem:[%s5391_s11] sm:$0xff] }
 0x3c6   :  { %1998 = vmatpush.bf16.msra.mxu3 %v3904_v62 }
 0x3c7   :  { %v5095_v59 = vpop.f32.mrf.mxu2 }
 0x3c8   :  { %1765 = vmatpush.bf16.msrb.mxu2 %v3892_v34  ;;  %v3912_v34 = vld [vmem:[%s5392_s10] sm:$0xff] }
 0x3c9   :  { %1715 = vmatpush.bf16.msra.mxu1 %v3885_v63  ;;  %v3920_v63 = vld [vmem:[%s5392_s10 + $0x40] sm:$0xff]  ;;  %2111 = vmatpush.bf16.msrb.mxu0 %v3912_v34 }
 0x3cc   :  { %1766 = vmatpush.bf16.msrb.mxu2 %v3891_v35 }
 0x3cd   :  { %1716 = vmatpush.bf16.msra.mxu1 %v3884_v28 }
 0x3cf   :  { %v5116_v29 = vpop.f32.mrf.mxu2 }
 0x3d0   :  { %1767 = vmatpush.bf16.msrb.mxu2 %v3890_v53 }
 0x3d1   :  { %1717 = vmatpush.bf16.msra.mxu1 %v3883_v58  ;;  %v5142_v58 = vld [vmem:[%s5390_s9] ss:$0 sm:$0xff] }
 0x3d2   :  { %v1260_v50 = vadd.f32 %v5142_v58, %v5023_v40  ;;  %v1265_v40 = vadd.f32 %v5142_v58, %v5029_v44  ;;  %v1270_v44 = vadd.f32 %v5142_v58, %v5036_v49  ;;  %v1275_v49 = vadd.f32 %v5142_v58, %v5042_v8 }
 0x3d3   :  { %v1280_v8 = vadd.f32 %v5142_v58, %v5049_v54  ;;  %v1285_v54 = vadd.f32 %v5142_v58, %v5073_v9  ;;  %v1290_v9 = vadd.f32 %v5142_v58, %v5116_v29 }
 0x3d4   :  { %1768 = vmatpush.bf16.msrb.mxu2 %v3889_v37 }
 0x3d5   :  { %1718 = vmatpush.bf16.msra.mxu1 %v3882_v38 }
 0x3d7   :  { %v5137_v35 = vpop.f32.mrf.mxu2 }
 0x3d8   :  { %1769 = vmatpush.bf16.msrb.mxu2 %v3888_v41 }
 0x3d9   :  { %1719 = vmatpush.bf16.msra.mxu1 %v3881_v43  ;;  %v1255_v43 = vadd.f32 %v5142_v58, %v5019_v0  ;;  %v1262_v0 = vadd.f32 %v5142_v58, %v5026_v7  ;;  %v1267_v7 = vadd.f32 %v5142_v58, %v5033_v46  ;;  %v1272_v46 = vadd.f32 %v5142_v58, %v5039_v51 }
 0x3da   :  { %v1277_v51 = vadd.f32 %v5142_v58, %v5045_v19  ;;  %v1282_v19 = vadd.f32 %v5142_v58, %v5052_v55  ;;  %v1287_v55 = vadd.f32 %v5142_v58, %v5095_v59  ;;  %v1292_v59 = vadd.f32 %v5142_v58, %v5137_v35 }
 0x3db   :  { %1770 = vmatmul.bf16.vlgmr.msrb.gmra.mxu2 %v4764_v11 }
 0x3dd   :  { %1720 = vmatpush.bf16.msra.mxu1 %v3880_v5  ;;  %v1257_v5 = vadd.f32 %v5142_v58, %v5021_v13 }
 0x3e0   :  { %1721 = vmatmul.bf16.vlgmr.msra.gmra.mxu1 %v4791_v30 }
 0x3e1   :  { %2250 = vmatpush.bf16.msrb.mxu1 %v3927_v12 }
 0x3e5   :  { %2251 = vmatpush.bf16.msrb.mxu1 %v3926_v4 }
 0x3e9   :  { %2252 = vmatpush.bf16.msrb.mxu1 %v3925_v16 }
 0x3eb   :  { %1775 = vmatmul.bf16.gmra.mxu2 %v4773_v17 }
 0x3ed   :  { %2253 = vmatpush.bf16.msrb.mxu1 %v3924_v18 }
 0x3f0   :  { %1726 = vmatmul.bf16.gmra.mxu1 %v4809_v36 }
 0x3f1   :  { %2254 = vmatpush.bf16.msrb.mxu1 %v3923_v21 }
 0x3f5   :  { %2255 = vmatpush.bf16.msrb.mxu1 %v3922_v27 }
 0x3f9   :  { %2256 = vmatpush.bf16.msrb.mxu1 %v3921_v2 }
 0x3fb   :  { %1780 = vmatmul.bf16.gmra.mxu2 %v4782_v24 }
 0x3fd   :  { %2257 = vmatpush.bf16.msrb.mxu1 %v3920_v63 }
 0x400   :  { %1731 = vmatmul.bf16.gmra.mxu1 %v4827_v42 }
 0x40b   :  { %1785 = vmatmul.bf16.gmra.mxu2 %v4800_v33 }
 0x410   :  { %1736 = vmatmul.bf16.gmra.mxu1 %v4845_v48 }
 0x41b   :  { %1790 = vmatmul.bf16.gmra.mxu2 %v4818_v39 }
 0x420   :  { %1741 = vmatmul.bf16.gmra.mxu1 %v4865_v56 }
 0x42b   :  { %1795 = vmatmul.bf16.gmra.mxu2 %v4836_v45 }
 0x430   :  { %1746 = vmatmul.bf16.gmra.mxu1 %v4885_v6 }
 0x43b   :  { %1800 = vmatmul.bf16.gmra.mxu2 %v4854_v52 }
 0x440   :  { %1751 = vmatmul.bf16.gmra.mxu1 %v4916_v22 }
 0x44b   :  { %1805 = vmatmul.bf16.gmra.mxu2 %v4876_v1 }
 0x450   :  { %1756 = vmatmul.bf16.gmra.mxu1 %v4961_v47 }
 0x45d   :  { %v1722_v28 = vpop.f32.mrf.mxu1 }
 0x45e   :  { %v1771_v53 = vpop.f32.mrf.mxu2 }
 0x45f   :  { %v1772_v37 = vadd.f32 %v1771_v53, %v1722_v28 }
 0x461   :  { %v1811_v10 = vadd.f32 %v1772_v37, %v1255_v43 }
 0x465   :  { %v1724_v38 = vpop.f32.mrf.mxu1 }
 0x466   :  { %v1773_v41 = vpop.f32.mrf.mxu2 }
 0x467   :  { %v1774_v26 = vadd.f32 %v1773_v41, %v1724_v38 }
 0x469   :  { %v1812_v12 = vadd.f32 %v1774_v26, %v1257_v5 }
 0x46b   :  { %v4211_v57 = vpack.c.bf16 %v1812_v12, %v1811_v10 }
 0x46d   :  { %4212 = vst [vmem:[#allocation2 + $0x30] sm:$0xff] %v4211_v57   ;;  %v1727_v3 = vpop.f32.mrf.mxu1 }
 0x46e   :  { %v1776_v4 = vpop.f32.mrf.mxu2 }
 0x46f   :  { %v1777_v15 = vadd.f32 %v1776_v4, %v1727_v3 }
 0x471   :  { %v1813_v18 = vadd.f32 %v1777_v15, %v1260_v50 }
 0x474   :  { %v3896_v14 = vld [vmem:[#allocation2 + $0x30] sm:$0xff] }
 0x475   :  { %v1729_v16 = vpop.f32.mrf.mxu1  ;;  %1999 = vmatmul.bf16.vlgmr.msra.gmra.mxu3 %v3896_v14  ;;  %2112 = vmatmul.bf16.vlgmr.msrb.gmra.mxu0 %v3896_v14 }
 0x476   :  { %v1778_v61 = vpop.f32.mrf.mxu2  ;;  %2258 = vmatmul.bf16.vlgmr.msrb.gmra.mxu1 %v3896_v14 }
 0x477   :  { %v1779_v13 = vadd.f32 %v1778_v61, %v1729_v16 }
 0x479   :  { %v1814_v60 = vadd.f32 %v1779_v13, %v1262_v0 }
 0x47b   :  { %v4216_v20 = vpack.c.bf16 %v1814_v60, %v1813_v18 }
 0x47d   :  { %4412 = vst [vmem:[#allocation2] sm:$0xff] %v4216_v20   ;;  %v1732_v21 = vpop.f32.mrf.mxu1 }
 0x47e   :  { %v1781_v23 = vpop.f32.mrf.mxu2 }
 0x47f   :  { %v1782_v27 = vadd.f32 %v1781_v23, %v1732_v21 }
 0x481   :  { %v1815_v62 = vadd.f32 %v1782_v27, %v1265_v40 }
 0x484   :  { %v3897_v25 = vld [vmem:[#allocation2] sm:$0xff] }
 0x485   :  { %v1734_v31 = vpop.f32.mrf.mxu1  ;;  %2004 = vmatmul.bf16.gmra.mxu3 %v3897_v25  ;;  %2117 = vmatmul.bf16.gmra.mxu0 %v3897_v25 }
 0x486   :  { %v1783_v32 = vpop.f32.mrf.mxu2  ;;  %2263 = vmatmul.bf16.gmra.mxu1 %v3897_v25 }
 0x487   :  { %v1784_v2 = vadd.f32 %v1783_v32, %v1734_v31 }
 0x489   :  { %v1816_v34 = vadd.f32 %v1784_v2, %v1267_v7 }
 0x48b   :  { %v4221_v63 = vpack.c.bf16 %v1816_v34, %v1815_v62 }
 0x48d   :  { %4413 = vst [vmem:[#allocation2 + $0x18] sm:$0xff] %v4221_v63   ;;  %v1737_v28 = vpop.f32.mrf.mxu1 }
 0x48e   :  { %v1786_v53 = vpop.f32.mrf.mxu2 }
 0x48f   :  { %v1787_v38 = vadd.f32 %v1786_v53, %v1737_v28 }
 0x491   :  { %v1817_v26 = vadd.f32 %v1787_v38, %v1270_v44 }
 0x494   :  { %v3898_v37 = vld [vmem:[#allocation2 + $0x18] sm:$0xff] }
 0x495   :  { %v1739_v41 = vpop.f32.mrf.mxu1  ;;  %2009 = vmatmul.bf16.gmra.mxu3 %v3898_v37  ;;  %2122 = vmatmul.bf16.gmra.mxu0 %v3898_v37 }
 0x496   :  { %v1788_v43 = vpop.f32.mrf.mxu2  ;;  %2268 = vmatmul.bf16.gmra.mxu1 %v3898_v37 }
 0x497   :  { %v1789_v5 = vadd.f32 %v1788_v43, %v1739_v41 }
 0x499   :  { %v1818_v10 = vadd.f32 %v1789_v5, %v1272_v46 }
 0x49b   :  { %v4226_v12 = vpack.c.bf16 %v1818_v10, %v1817_v26 }
 0x49d   :  { %4414 = vst [vmem:[#allocation2 + $0x10] sm:$0xff] %v4226_v12   ;;  %v1742_v57 = vpop.f32.mrf.mxu1 }
 0x49e   :  { %v1791_v3 = vpop.f32.mrf.mxu2 }
 0x49f   :  { %v1792_v14 = vadd.f32 %v1791_v3, %v1742_v57 }
 0x4a1   :  { %v1819_v50 = vadd.f32 %v1792_v14, %v1275_v49 }
 0x4a4   :  { %v3899_v4 = vld [vmem:[#allocation2 + $0x10] sm:$0xff] }
 0x4a5   :  { %v1744_v15 = vpop.f32.mrf.mxu1  ;;  %2014 = vmatmul.bf16.gmra.mxu3 %v3899_v4  ;;  %2127 = vmatmul.bf16.gmra.mxu0 %v3899_v4 }
 0x4a6   :  { %v1793_v16 = vpop.f32.mrf.mxu2  ;;  %2273 = vmatmul.bf16.gmra.mxu1 %v3899_v4 }
 0x4a7   :  { %v1794_v61 = vadd.f32 %v1793_v16, %v1744_v15 }
 0x4a9   :  { %v1820_v0 = vadd.f32 %v1794_v61, %v1277_v51 }
 0x4ab   :  { %v4231_v13 = vpack.c.bf16 %v1820_v0, %v1819_v50 }
 0x4ad   :  { %4415 = vst [vmem:[#allocation2 + $0x8] sm:$0xff] %v4231_v13   ;;  %v1747_v18 = vpop.f32.mrf.mxu1 }
 0x4ae   :  { %v1796_v60 = vpop.f32.mrf.mxu2 }
 0x4af   :  { %v1797_v21 = vadd.f32 %v1796_v60, %v1747_v18 }
 0x4b1   :  { %v1821_v31 = vadd.f32 %v1797_v21, %v1280_v8 }
 0x4b4   :  { %v3900_v20 = vld [vmem:[#allocation2 + $0x8] sm:$0xff] }
 0x4b5   :  { %v1749_v23 = vpop.f32.mrf.mxu1  ;;  %2019 = vmatmul.bf16.gmra.mxu3 %v3900_v20  ;;  %2132 = vmatmul.bf16.gmra.mxu0 %v3900_v20 }
 0x4b6   :  { %v1798_v25 = vpop.f32.mrf.mxu2  ;;  %2278 = vmatmul.bf16.gmra.mxu1 %v3900_v20 }
 0x4b7   :  { %v1799_v27 = vadd.f32 %v1798_v25, %v1749_v23 }
 0x4b9   :  { %v1822_v32 = vadd.f32 %v1799_v27, %v1282_v19 }
 0x4bb   :  { %v4236_v40 = vpack.c.bf16 %v1822_v32, %v1821_v31 }
 0x4bd   :  { %4416 = vst [vmem:[#allocation2 + $0x20] sm:$0xff] %v4236_v40   ;;  %v1752_v7 = vpop.f32.mrf.mxu1 }
 0x4be   :  { %v1801_v2 = vpop.f32.mrf.mxu2 }
 0x4bf   :  { %v1802_v34 = vadd.f32 %v1801_v2, %v1752_v7 }
 0x4c1   :  { %v1823_v37 = vadd.f32 %v1802_v34, %v1285_v54 }
 0x4c4   :  { %v3901_v62 = vld [vmem:[#allocation2 + $0x20] sm:$0xff] }
 0x4c5   :  { %v1754_v63 = vpop.f32.mrf.mxu1  ;;  %2024 = vmatmul.bf16.gmra.mxu3 %v3901_v62  ;;  %2137 = vmatmul.bf16.gmra.mxu0 %v3901_v62 }
 0x4c6   :  { %v1803_v28 = vpop.f32.mrf.mxu2  ;;  %2283 = vmatmul.bf16.gmra.mxu1 %v3901_v62 }
 0x4c7   :  { %v1804_v53 = vadd.f32 %v1803_v28, %v1754_v63 }
 0x4c9   :  { %v1824_v38 = vadd.f32 %v1804_v53, %v1287_v55 }
 0x4cb   :  { %v4241_v41 = vpack.c.bf16 %v1824_v38, %v1823_v37 }
 0x4cd   :  { %4417 = vst [vmem:[#allocation2 + $0x28] sm:$0xff] %v4241_v41   ;;  %v1757_v43 = vpop.f32.mrf.mxu1 }
 0x4ce   :  { %v1806_v44 = vpop.f32.mrf.mxu2 }
 0x4cf   :  { %v1807_v5 = vadd.f32 %v1806_v44, %v1757_v43 }
 0x4d1   :  { %v1825_v57 = vadd.f32 %v1807_v5, %v1290_v9 }
 0x4d4   :  { %v3902_v46 = vld [vmem:[#allocation2 + $0x28] sm:$0xff] }
 0x4d5   :  { %v1759_v26 = vpop.f32.mrf.mxu1  ;;  %2029 = vmatmul.bf16.gmra.mxu3 %v3902_v46  ;;  %2142 = vmatmul.bf16.gmra.mxu0 %v3902_v46 }
 0x4d6   :  { %v1808_v10 = vpop.f32.mrf.mxu2  ;;  %2288 = vmatmul.bf16.gmra.mxu1 %v3902_v46 }
 0x4d7   :  { %v1809_v12 = vadd.f32 %v1808_v10, %v1759_v26 }
 0x4d9   :  { %v1826_v3 = vadd.f32 %v1809_v12, %v1292_v59 }
 0x4db   :  { %v4246_v4 = vpack.c.bf16 %v1826_v3, %v1825_v57 }
 0x4dd   :  { %4418 = vst [vmem:[#allocation2 + $0x38] sm:$0xff] %v4246_v4  }
 0x4e4   :  { %v3903_v14 = vld [vmem:[#allocation2 + $0x38] sm:$0xff] }
 0x4e5   :  { %2034 = vmatmul.bf16.gmra.mxu3 %v3903_v14  ;;  %2147 = vmatmul.bf16.gmra.mxu0 %v3903_v14 }
 0x4e6   :  { %2293 = vmatmul.bf16.gmra.mxu1 %v3903_v14 }
 0x4f2   :  { %v2113_v15 = vpop.f32.mrf.mxu0 }
 0x4f3   :  { %v2259_v16 = vpop.f32.mrf.mxu1 }
 0x4fa   :  { %v2115_v49 = vpop.f32.mrf.mxu0 }
 0x4fb   :  { %v4251_v51 = vpack.c.bf16 %v2115_v49, %v2113_v15  ;;  %v2261_v61 = vpop.f32.mrf.mxu1 }
 0x4fc   :  { %v4291_v50 = vpack.c.bf16 %v2261_v61, %v2259_v16  ;;  %v5176_v61 = vpop.f32.mrf.mxu3 }
 0x4fd   :  { %4252 = vst [vmem:[#allocation3] sm:$0xff] %v4251_v51  }
 0x4fe   :  { %4426 = vst [vmem:[#allocation3 + $0x28] sm:$0xff] %v4291_v50  }
 0x502   :  { %v2118_v29 = vpop.f32.mrf.mxu0 }
 0x503   :  { %v2264_v35 = vpop.f32.mrf.mxu1 }
 0x50a   :  { %v2120_v58 = vpop.f32.mrf.mxu0 }
 0x50b   :  { %v4256_v0 = vpack.c.bf16 %v2120_v58, %v2118_v29  ;;  %v2266_v13 = vpop.f32.mrf.mxu1 }
 0x50c   :  { %v4296_v18 = vpack.c.bf16 %v2266_v13, %v2264_v35  ;;  %v5178_v13 = vpop.f32.mrf.mxu3 }
 0x50d   :  { %4419 = vst [vmem:[#allocation3 + $0x18] sm:$0xff] %v4256_v0  }
 0x50e   :  { %4427 = vst [vmem:[#allocation3 + $0x40] sm:$0xff] %v4296_v18  }
 0x512   :  { %v2123_v60 = vpop.f32.mrf.mxu0 }
 0x513   :  { %v2269_v20 = vpop.f32.mrf.mxu1 }
 0x51a   :  { %v2125_v21 = vpop.f32.mrf.mxu0 }
 0x51b   :  { %v4261_v23 = vpack.c.bf16 %v2125_v21, %v2123_v60  ;;  %v2271_v25 = vpop.f32.mrf.mxu1  ;;  %v3929_v21 = vld [vmem:[#allocation3 + $0x18] sm:$0xff] }
 0x51c   :  { %v4301_v8 = vpack.c.bf16 %v2271_v25, %v2269_v20  ;;  %v5180_v25 = vpop.f32.mrf.mxu3 }
 0x51d   :  { %4420 = vst [vmem:[#allocation3 + $0x50] sm:$0xff] %v4261_v23   ;;  %v3937_v23 = vld [vmem:[#allocation3 + $0x40] sm:$0xff] }
 0x51e   :  { %4428 = vst [vmem:[#allocation3 + $0x38] sm:$0xff] %v4301_v8   ;;  %v3928_v8 = vld [vmem:[#allocation3] sm:$0xff] }
 0x522   :  { %v2128_v19 = vpop.f32.mrf.mxu0 }
 0x523   :  { %v2274_v27 = vpop.f32.mrf.mxu1 }
 0x524   :  { %v3930_v60 = vld [vmem:[#allocation3 + $0x50] sm:$0xff] }
 0x525   :  { %v3938_v20 = vld [vmem:[#allocation3 + $0x38] sm:$0xff] }
 0x52a   :  { %v2130_v31 = vpop.f32.mrf.mxu0 }
 0x52b   :  { %v4266_v32 = vpack.c.bf16 %v2130_v31, %v2128_v19  ;;  %v2276_v40 = vpop.f32.mrf.mxu1  ;;  %v3936_v19 = vld [vmem:[#allocation3 + $0x28] sm:$0xff] }
 0x52c   :  { %v4306_v7 = vpack.c.bf16 %v2276_v40, %v2274_v27  ;;  %v5184_v27 = vpop.f32.mrf.mxu3 }
 0x52d   :  { %4421 = vst [vmem:[#allocation3 + $0x60] sm:$0xff] %v4266_v32  }
 0x52e   :  { %4429 = vst [vmem:[#allocation3 + $0x8] sm:$0xff] %v4306_v7  }
 0x532   :  { %v2133_v2 = vpop.f32.mrf.mxu0 }
 0x533   :  { %v2279_v62 = vpop.f32.mrf.mxu1 }
 0x534   :  { %v3931_v0 = vld [vmem:[#allocation3 + $0x60] sm:$0xff]  ;;  %v5186_v31 = vpop.f32.mrf.mxu3 }
 0x535   :  { %v3939_v18 = vld [vmem:[#allocation3 + $0x8] sm:$0xff] }
 0x53a   :  { %v2135_v34 = vpop.f32.mrf.mxu0 }
 0x53b   :  { %v4271_v63 = vpack.c.bf16 %v2135_v34, %v2133_v2  ;;  %v2281_v28 = vpop.f32.mrf.mxu1  ;;  %v3952_v2 = vld [vmem:[%s5394_s13] sm:$0xff] }
 0x53c   :  { %v4311_v54 = vpack.c.bf16 %v2281_v28, %v2279_v62  ;;  %v5190_v32 = vpop.f32.mrf.mxu3 }
 0x53d   :  { %4422 = vst [vmem:[#allocation3 + $0x68] sm:$0xff] %v4271_v63  }
 0x53e   :  { %4430 = vst [vmem:[#allocation3 + $0x58] sm:$0xff] %v4311_v54  }
 0x542   :  { %v2138_v55 = vpop.f32.mrf.mxu0 }
 0x543   :  { %v2284_v53 = vpop.f32.mrf.mxu1 }
 0x544   :  { %v3932_v35 = vld [vmem:[#allocation3 + $0x68] sm:$0xff]  ;;  %v5194_v40 = vpop.f32.mrf.mxu3 }
 0x545   :  { %v3940_v58 = vld [vmem:[#allocation3 + $0x58] sm:$0xff] }
 0x54a   :  { %v2140_v37 = vpop.f32.mrf.mxu0 }
 0x54b   :  { %v4276_v38 = vpack.c.bf16 %v2140_v37, %v2138_v55  ;;  %v2286_v41 = vpop.f32.mrf.mxu1 }
 0x54c   :  { %v4316_v43 = vpack.c.bf16 %v2286_v41, %v2284_v53  ;;  %v5196_v7 = vpop.f32.mrf.mxu3 }
 0x54d   :  { %4423 = vst [vmem:[#allocation3 + $0x20] sm:$0xff] %v4276_v38  }
 0x54e   :  { %4431 = vst [vmem:[#allocation3 + $0x48] sm:$0xff] %v4316_v43  }
 0x552   :  { %v2143_v44 = vpop.f32.mrf.mxu0 }
 0x553   :  { %v2289_v46 = vpop.f32.mrf.mxu1 }
 0x554   :  { %v3933_v50 = vld [vmem:[#allocation3 + $0x20] sm:$0xff] }
 0x555   :  { %v3941_v29 = vld [vmem:[#allocation3 + $0x48] sm:$0xff] }
 0x55a   :  { %v2145_v5 = vpop.f32.mrf.mxu0 }
 0x55b   :  { %v4281_v26 = vpack.c.bf16 %v2145_v5, %v2143_v44  ;;  %v2291_v10 = vpop.f32.mrf.mxu1 }
 0x55c   :  { %v4321_v9 = vpack.c.bf16 %v2291_v10, %v2289_v46 }
 0x55d   :  { %4424 = vst [vmem:[#allocation3 + $0x70] sm:$0xff] %v4281_v26  }
 0x55e   :  { %4432 = vst [vmem:[#allocation3 + $0x78] sm:$0xff] %v4321_v9  }
 0x562   :  { %v2148_v59 = vpop.f32.mrf.mxu0 }
 0x563   :  { %v2294_v12 = vpop.f32.mrf.mxu1 }
 0x564   :  { %v3934_v49 = vld [vmem:[#allocation3 + $0x70] sm:$0xff] }
 0x565   :  { %v3942_v51 = vld [vmem:[#allocation3 + $0x78] sm:$0xff] }
 0x56a   :  { %v2150_v57 = vpop.f32.mrf.mxu0 }
 0x56b   :  { %v4286_v3 = vpack.c.bf16 %v2150_v57, %v2148_v59  ;;  %v2296_v4 = vpop.f32.mrf.mxu1 }
 0x56c   :  { %v4326_v14 = vpack.c.bf16 %v2296_v4, %v2294_v12 }
 0x56d   :  { %4425 = vst [vmem:[#allocation3 + $0x10] sm:$0xff] %v4286_v3  }
 0x56e   :  { %4433 = vst [vmem:[#allocation3 + $0x30] sm:$0xff] %v4326_v14  }
 0x574   :  { %v3935_v15 = vld [vmem:[#allocation3 + $0x10] sm:$0xff] }
 0x575   :  { %v3943_v16 = vld [vmem:[#allocation3 + $0x30] sm:$0xff]  ;;  %2459 = vmatpush.bf16.msra.mxu2 %v3935_v15 }
 0x576   :  { %2508 = vmatpush.bf16.msrb.mxu3 %v3943_v16 }
 0x579   :  { %2460 = vmatpush.bf16.msra.mxu2 %v3934_v49 }
 0x57a   :  { %2509 = vmatpush.bf16.msrb.mxu3 %v3942_v51 }
 0x57d   :  { %2461 = vmatpush.bf16.msra.mxu2 %v3933_v50 }
 0x57e   :  { %2510 = vmatpush.bf16.msrb.mxu3 %v3941_v29 }
 0x581   :  { %2462 = vmatpush.bf16.msra.mxu2 %v3932_v35 }
 0x582   :  { %2511 = vmatpush.bf16.msrb.mxu3 %v3940_v58 }
 0x585   :  { %2463 = vmatpush.bf16.msra.mxu2 %v3931_v0 }
 0x586   :  { %2512 = vmatpush.bf16.msrb.mxu3 %v3939_v18 }
 0x589   :  { %2464 = vmatpush.bf16.msra.mxu2 %v3930_v60 }
 0x58a   :  { %2513 = vmatpush.bf16.msrb.mxu3 %v3938_v20 }
 0x58d   :  { %2465 = vmatpush.bf16.msra.mxu2 %v3929_v21 }
 0x58e   :  { %2514 = vmatpush.bf16.msrb.mxu3 %v3937_v23 }
 0x591   :  { %2466 = vmatpush.bf16.msra.mxu2 %v3928_v8 }
 0x592   :  { %2515 = vmatpush.bf16.msrb.mxu3 %v3936_v19 }
 0x594   :  { %2467 = vmatmul.bf16.vlgmr.msra.gmra.mxu2 %v4791_v30 }
 0x595   :  { %2516 = vmatmul.bf16.vlgmr.msrb.gmra.mxu3 %v4764_v11  ;;  %v5200_v11 = vpop.f32.mrf.mxu3 }
 0x59d   :  { %v5202_v30 = vpop.f32.mrf.mxu3 }
 0x5a4   :  { %2472 = vmatmul.bf16.gmra.mxu2 %v4809_v36 }
 0x5a5   :  { %2521 = vmatmul.bf16.gmra.mxu3 %v4773_v17  ;;  %v5206_v17 = vpop.f32.mrf.mxu3 }
 0x5ad   :  { %v5216_v36 = vpop.f32.mrf.mxu3 }
 0x5b4   :  { %2477 = vmatmul.bf16.gmra.mxu2 %v4827_v42 }
 0x5b5   :  { %2526 = vmatmul.bf16.gmra.mxu3 %v4782_v24  ;;  %v3959_v24 = vld [vmem:[%s5394_s13 + $0x38] sm:$0xff]  ;;  %v5218_v42 = vpop.f32.mrf.mxu3 }
 0x5b6   :  { %2737 = vmatpush.bf16.msra.mxu0 %v3959_v24 }
 0x5c4   :  { %2482 = vmatmul.bf16.gmra.mxu2 %v4845_v48  ;;  %v5228_v48 = vpop.f32.mrf.mxu3 }
 0x5c5   :  { %2531 = vmatmul.bf16.gmra.mxu3 %v4800_v33  ;;  %v3958_v33 = vld [vmem:[%s5394_s13 + $0x30] sm:$0xff] }
 0x5c6   :  { %2738 = vmatpush.bf16.msra.mxu0 %v3958_v33 }
 0x5d4   :  { %2487 = vmatmul.bf16.gmra.mxu2 %v4865_v56  ;;  %v3955_v56 = vld [vmem:[%s5394_s13 + $0x18] sm:$0xff] }
 0x5d5   :  { %2536 = vmatmul.bf16.gmra.mxu3 %v4818_v39  ;;  %v3957_v39 = vld [vmem:[%s5394_s13 + $0x28] sm:$0xff] }
 0x5d6   :  { %2739 = vmatpush.bf16.msra.mxu0 %v3957_v39 }
 0x5e4   :  { %2492 = vmatmul.bf16.gmra.mxu2 %v4885_v6  ;;  %v5238_v6 = vpop.f32.mrf.mxu3 }
 0x5e5   :  { %2541 = vmatmul.bf16.gmra.mxu3 %v4836_v45  ;;  %v3956_v45 = vld [vmem:[%s5394_s13 + $0x20] sm:$0xff] }
 0x5e6   :  { %2740 = vmatpush.bf16.msra.mxu0 %v3956_v45 }
 0x5ea   :  { %2741 = vmatpush.bf16.msra.mxu0 %v3955_v56 }
 0x5ec   :  { %v5246_v62 = vpop.f32.mrf.mxu3 }
 0x5f4   :  { %2497 = vmatmul.bf16.gmra.mxu2 %v4916_v22  ;;  %v3953_v22 = vld [vmem:[%s5394_s13 + $0x8] sm:$0xff] }
 0x5f5   :  { %2546 = vmatmul.bf16.gmra.mxu3 %v4854_v52  ;;  %v3954_v52 = vld [vmem:[%s5394_s13 + $0x10] sm:$0xff] }
 0x5f6   :  { %2742 = vmatpush.bf16.msra.mxu0 %v3954_v52 }
 0x5fa   :  { %2743 = vmatpush.bf16.msra.mxu0 %v3953_v22 }
 0x5fe   :  { %2744 = vmatpush.bf16.msra.mxu0 %v3952_v2 }
 0x604   :  { %2502 = vmatmul.bf16.gmra.mxu2 %v4961_v47 }
 0x605   :  { %2551 = vmatmul.bf16.gmra.mxu3 %v4876_v1  ;;  %v5251_v1 = vld [vmem:[%s5393_s12] ss:$0 sm:$0xff] }
 0x606   :  { %v2001_v55 = vadd.f32 %v5251_v1, %v5176_v61  ;;  %v2003_v53 = vadd.f32 %v5251_v1, %v5178_v13  ;;  %v2006_v59 = vadd.f32 %v5251_v1, %v5180_v25  ;;  %v2008_v12 = vadd.f32 %v5251_v1, %v5184_v27 }
 0x607   :  { %v2011_v29 = vadd.f32 %v5251_v1, %v5186_v31  ;;  %v2013_v35 = vadd.f32 %v5251_v1, %v5190_v32  ;;  %v2016_v19 = vadd.f32 %v5251_v1, %v5194_v40  ;;  %v2018_v27 = vadd.f32 %v5251_v1, %v5196_v7 }
 0x608   :  { %v2023_v40 = vadd.f32 %v5251_v1, %v5202_v30 }
 0x617   :  { %v2468_v34 = vpop.f32.mrf.mxu2 }
 0x618   :  { %v2517_v63 = vpop.f32.mrf.mxu3 }
 0x619   :  { %v2518_v47 = vadd.f32 %v2517_v63, %v2468_v34  ;;  %v2021_v34 = vadd.f32 %v5251_v1, %v5200_v11  ;;  %v2028_v11 = vadd.f32 %v5251_v1, %v5216_v36  ;;  %v2031_v36 = vadd.f32 %v5251_v1, %v5218_v42 }
 0x61b   :  { %v2557_v38 = vadd.f32 %v2518_v47, %v2001_v55 }
 0x61f   :  { %v2470_v28 = vpop.f32.mrf.mxu2 }
 0x620   :  { %v2519_v54 = vpop.f32.mrf.mxu3 }
 0x621   :  { %v2520_v37 = vadd.f32 %v2519_v54, %v2470_v28 }
 0x623   :  { %v2558_v41 = vadd.f32 %v2520_v37, %v2003_v53 }
 0x625   :  { %v4331_v43 = vpack.c.bf16 %v2558_v41, %v2557_v38 }
 0x627   :  { %4332 = vst [vmem:[#allocation2 + $0x30] sm:$0xff] %v4331_v43   ;;  %v2473_v44 = vpop.f32.mrf.mxu2  ;;  %v2026_v43 = vadd.f32 %v5251_v1, %v5206_v17  ;;  %v3966_v17 = vld [vmem:[%s5396_s15 + $0x30] sm:$0xff] }
 0x628   :  { %v2522_v46 = vpop.f32.mrf.mxu3 }
 0x629   :  { %v2523_v26 = vadd.f32 %v2522_v46, %v2473_v44 }
 0x62b   :  { %v2559_v3 = vadd.f32 %v2523_v26, %v2006_v59 }
 0x62e   :  { %v3944_v5 = vld [vmem:[#allocation2 + $0x30] sm:$0xff] }
 0x62f   :  { %v2475_v10 = vpop.f32.mrf.mxu2  ;;  %2745 = vmatmul.bf16.vlgmr.msra.gmra.mxu0 %v3944_v5 }
 0x630   :  { %v2524_v9 = vpop.f32.mrf.mxu3 }
 0x631   :  { %v2525_v57 = vadd.f32 %v2524_v9, %v2475_v10  ;;  %v3967_v10 = vld [vmem:[%s5396_s15 + $0x38] sm:$0xff] }
 0x632   :  { %2910 = vmatpush.bf16.msra.mxu1 %v3967_v10 }
 0x633   :  { %v2560_v4 = vadd.f32 %v2525_v57, %v2008_v12 }
 0x635   :  { %v4336_v14 = vpack.c.bf16 %v2560_v4, %v2559_v3  ;;  %v2033_v4 = vadd.f32 %v5251_v1, %v5228_v48  ;;  %v3963_v48 = vld [vmem:[%s5396_s15 + $0x18] sm:$0xff] }
 0x636   :  { %2911 = vmatpush.bf16.msra.mxu1 %v3966_v17 }
 0x637   :  { %4434 = vst [vmem:[#allocation2] sm:$0xff] %v4336_v14   ;;  %v2478_v15 = vpop.f32.mrf.mxu2 }
 0x638   :  { %v2527_v16 = vpop.f32.mrf.mxu3 }
 0x639   :  { %v2528_v51 = vadd.f32 %v2527_v16, %v2478_v15  ;;  %v3965_v15 = vld [vmem:[%s5396_s15 + $0x28] sm:$0xff] }
 0x63a   :  { %2912 = vmatpush.bf16.msra.mxu1 %v3965_v15 }
 0x63b   :  { %v2561_v0 = vadd.f32 %v2528_v51, %v2011_v29 }
 0x63e   :  { %v3945_v49 = vld [vmem:[#allocation2] sm:$0xff] }
 0x63f   :  { %v2480_v61 = vpop.f32.mrf.mxu2  ;;  %2750 = vmatmul.bf16.gmra.mxu0 %v3945_v49 }
 0x640   :  { %v2529_v50 = vpop.f32.mrf.mxu3 }
 0x641   :  { %v2530_v58 = vadd.f32 %v2529_v50, %v2480_v61  ;;  %v3964_v61 = vld [vmem:[%s5396_s15 + $0x20] sm:$0xff] }
 0x642   :  { %2913 = vmatpush.bf16.msra.mxu1 %v3964_v61 }
 0x643   :  { %v2562_v13 = vadd.f32 %v2530_v58, %v2013_v35 }
 0x645   :  { %v4341_v18 = vpack.c.bf16 %v2562_v13, %v2561_v0  ;;  %v3962_v13 = vld [vmem:[%s5396_s15 + $0x10] sm:$0xff] }
 0x646   :  { %2914 = vmatpush.bf16.msra.mxu1 %v3963_v48 }
 0x647   :  { %4435 = vst [vmem:[#allocation2 + $0x18] sm:$0xff] %v4341_v18   ;;  %v2483_v60 = vpop.f32.mrf.mxu2  ;;  %v2036_v18 = vadd.f32 %v5251_v1, %v5238_v6 }
 0x648   :  { %v2532_v20 = vpop.f32.mrf.mxu3 }
 0x649   :  { %v2533_v23 = vadd.f32 %v2532_v20, %v2483_v60  ;;  %v2038_v60 = vadd.f32 %v5251_v1, %v5246_v62  ;;  %v5312_v62 = vld [vmem:[%s5395_s14] ss:$0 sm:$0xff] }
 0x64a   :  { %2915 = vmatpush.bf16.msra.mxu1 %v3962_v13 }
 0x64b   :  { %v2563_v32 = vadd.f32 %v2533_v23, %v2016_v19  ;;  %v3960_v19 = vld [vmem:[%s5396_s15] sm:$0xff] }
 0x64e   :  { %v3946_v21 = vld [vmem:[#allocation2 + $0x18] sm:$0xff] }
 0x64f   :  { %v2485_v25 = vpop.f32.mrf.mxu2  ;;  %2755 = vmatmul.bf16.gmra.mxu0 %v3946_v21 }
 0x650   :  { %v2534_v8 = vpop.f32.mrf.mxu3 }
 0x651   :  { %v2535_v31 = vadd.f32 %v2534_v8, %v2485_v25  ;;  %v3961_v25 = vld [vmem:[%s5396_s15 + $0x8] sm:$0xff] }
 0x652   :  { %2916 = vmatpush.bf16.msra.mxu1 %v3961_v25 }
 0x653   :  { %v2564_v24 = vadd.f32 %v2535_v31, %v2018_v27 }
 0x655   :  { %v4346_v33 = vpack.c.bf16 %v2564_v24, %v2563_v32 }
 0x656   :  { %2917 = vmatpush.bf16.msra.mxu1 %v3960_v19 }
 0x657   :  { %4436 = vst [vmem:[#allocation2 + $0x10] sm:$0xff] %v4346_v33   ;;  %v2488_v39 = vpop.f32.mrf.mxu2 }
 0x658   :  { %v2537_v45 = vpop.f32.mrf.mxu3 }
 0x659   :  { %v2538_v52 = vadd.f32 %v2537_v45, %v2488_v39 }
 0x65b   :  { %v2565_v7 = vadd.f32 %v2538_v52, %v2021_v34 }
 0x65e   :  { %v3947_v56 = vld [vmem:[#allocation2 + $0x10] sm:$0xff] }
 0x65f   :  { %v2490_v22 = vpop.f32.mrf.mxu2  ;;  %2760 = vmatmul.bf16.gmra.mxu0 %v3947_v56 }
 0x660   :  { %v2539_v2 = vpop.f32.mrf.mxu3 }
 0x661   :  { %v2540_v63 = vadd.f32 %v2539_v2, %v2490_v22 }
 0x663   :  { %v2566_v47 = vadd.f32 %v2540_v63, %v2023_v40 }
 0x665   :  { %v4351_v28 = vpack.c.bf16 %v2566_v47, %v2565_v7 }
 0x667   :  { %4437 = vst [vmem:[#allocation2 + $0x8] sm:$0xff] %v4351_v28   ;;  %v2493_v54 = vpop.f32.mrf.mxu2 }
 0x668   :  { %v2542_v55 = vpop.f32.mrf.mxu3 }
 0x669   :  { %v2543_v37 = vadd.f32 %v2542_v55, %v2493_v54 }
 0x66b   :  { %v2567_v30 = vadd.f32 %v2543_v37, %v2026_v43 }
 0x66e   :  { %v3948_v53 = vld [vmem:[#allocation2 + $0x8] sm:$0xff] }
 0x66f   :  { %v2495_v38 = vpop.f32.mrf.mxu2  ;;  %2765 = vmatmul.bf16.gmra.mxu0 %v3948_v53 }
 0x670   :  { %v2544_v41 = vpop.f32.mrf.mxu3 }
 0x671   :  { %v2545_v44 = vadd.f32 %v2544_v41, %v2495_v38 }
 0x673   :  { %v2568_v46 = vadd.f32 %v2545_v44, %v2028_v11 }
 0x675   :  { %v4356_v5 = vpack.c.bf16 %v2568_v46, %v2567_v30 }
 0x677   :  { %4438 = vst [vmem:[#allocation2 + $0x20] sm:$0xff] %v4356_v5   ;;  %v2498_v26 = vpop.f32.mrf.mxu2 }
 0x678   :  { %v2547_v9 = vpop.f32.mrf.mxu3 }
 0x679   :  { %v2548_v12 = vadd.f32 %v2547_v9, %v2498_v26 }
 0x67b   :  { %v2569_v16 = vadd.f32 %v2548_v12, %v2031_v36 }
 0x67e   :  { %v3949_v59 = vld [vmem:[#allocation2 + $0x20] sm:$0xff] }
 0x67f   :  { %v2500_v57 = vpop.f32.mrf.mxu2  ;;  %2770 = vmatmul.bf16.gmra.mxu0 %v3949_v59 }
 0x680   :  { %v2549_v3 = vpop.f32.mrf.mxu3 }
 0x681   :  { %v2550_v14 = vadd.f32 %v2549_v3, %v2500_v57 }
 0x683   :  { %v2570_v49 = vadd.f32 %v2550_v14, %v2033_v4 }
 0x685   :  { %v4361_v51 = vpack.c.bf16 %v2570_v49, %v2569_v16 }
 0x687   :  { %4439 = vst [vmem:[#allocation2 + $0x28] sm:$0xff] %v4361_v51   ;;  %v2503_v50 = vpop.f32.mrf.mxu2 }
 0x688   :  { %v2552_v42 = vpop.f32.mrf.mxu3 }
 0x689   :  { %v2553_v35 = vadd.f32 %v2552_v42, %v2503_v50 }
 0x68b   :  { %v2571_v21 = vadd.f32 %v2553_v35, %v2036_v18 }
 0x68e   :  { %v3950_v29 = vld [vmem:[#allocation2 + $0x28] sm:$0xff] }
 0x68f   :  { %v2505_v58 = vpop.f32.mrf.mxu2  ;;  %2775 = vmatmul.bf16.gmra.mxu0 %v3950_v29 }
 0x690   :  { %v2554_v0 = vpop.f32.mrf.mxu3 }
 0x691   :  { %v2555_v20 = vadd.f32 %v2554_v0, %v2505_v58 }
 0x693   :  { %v2572_v23 = vadd.f32 %v2555_v20, %v2038_v60 }
 0x695   :  { %v4366_v8 = vpack.c.bf16 %v2572_v23, %v2571_v21 }
 0x697   :  { %4440 = vst [vmem:[#allocation2 + $0x38] sm:$0xff] %v4366_v8  }
 0x69e   :  { %v3951_v6 = vld [vmem:[#allocation2 + $0x38] sm:$0xff] }
 0x69f   :  { %2780 = vmatmul.bf16.gmra.mxu0 %v3951_v6 }
 0x6ac   :  { %v2746_v27 = vpop.f32.mrf.mxu0 }
 0x6ad   :  { %v2747_v1 = vadd.f32 %v5312_v62, %v2746_v27 }
 0x6af   :  { %v2802_v32 = vmul.f32 0.01, %v2747_v1  ;;  %vm2786_vm1 = vcmp.ge.f32.partialorder %v2747_v1, 0.0 }
 0x6b1   :  { %v2818_v39 = vsel %vm2786_vm1, %v2747_v1, %v2802_v32 }
 0x6b4   :  { %v2748_v31 = vpop.f32.mrf.mxu0 }
 0x6b5   :  { %v2749_v24 = vadd.f32 %v5312_v62, %v2748_v31 }
 0x6b7   :  { %vm2787_vm2 = vcmp.ge.f32.partialorder %v2749_v24, 0.0  ;;  %v2803_v33 = vmul.f32 0.01, %v2749_v24 }
 0x6b9   :  { %v2819_v45 = vsel %vm2787_vm2, %v2749_v24, %v2803_v33 }
 0x6ba   :  { %v2834_v56 = vpack.c.bf16 %v2819_v45, %v2818_v39 }
 0x6bc   :  { %v2751_v52 = vpop.f32.mrf.mxu0  ;;  %2918 = vmatmul.bf16.vlgmr.msra.gmra.mxu1 %v2834_v56 }
 0x6bd   :  { %v2752_v22 = vadd.f32 %v5312_v62, %v2751_v52  ;;  %v4463_v52 = vld [vmem:[%s5397_s16] ss:$0 sm:$0xff] }
 0x6bf   :  { %v2804_v34 = vmul.f32 0.01, %v2752_v22  ;;  %vm2788_vm3 = vcmp.ge.f32.partialorder %v2752_v22, 0.0 }
 0x6c1   :  { %v2820_v7 = vsel %vm2788_vm3, %v2752_v22, %v2804_v34 }
 0x6c4   :  { %v2753_v2 = vpop.f32.mrf.mxu0 }
 0x6c5   :  { %v2754_v40 = vadd.f32 %v5312_v62, %v2753_v2 }
 0x6c7   :  { %vm2789_vm4 = vcmp.ge.f32.partialorder %v2754_v40, 0.0  ;;  %v2805_v63 = vmul.f32 0.01, %v2754_v40 }
 0x6c9   :  { %v2821_v47 = vsel %vm2789_vm4, %v2754_v40, %v2805_v63 }
 0x6ca   :  { %v2835_v28 = vpack.c.bf16 %v2821_v47, %v2820_v7 }
 0x6cc   :  { %v2756_v54 = vpop.f32.mrf.mxu0  ;;  %2923 = vmatmul.bf16.gmra.mxu1 %v2835_v28 }
 0x6cd   :  { %v2757_v55 = vadd.f32 %v5312_v62, %v2756_v54 }
 0x6cf   :  { %v2806_v37 = vmul.f32 0.01, %v2757_v55  ;;  %vm2790_vm5 = vcmp.ge.f32.partialorder %v2757_v55, 0.0 }
 0x6d1   :  { %v2822_v43 = vsel %vm2790_vm5, %v2757_v55, %v2806_v37 }
 0x6d4   :  { %v2758_v53 = vpop.f32.mrf.mxu0 }
 0x6d5   :  { %v2759_v38 = vadd.f32 %v5312_v62, %v2758_v53 }
 0x6d7   :  { %vm2791_vm6 = vcmp.ge.f32.partialorder %v2759_v38, 0.0  ;;  %v2807_v41 = vmul.f32 0.01, %v2759_v38 }
 0x6d9   :  { %v2823_v11 = vsel %vm2791_vm6, %v2759_v38, %v2807_v41 }
 0x6da   :  { %v2836_v44 = vpack.c.bf16 %v2823_v11, %v2822_v43 }
 0x6dc   :  { %v2761_v30 = vpop.f32.mrf.mxu0  ;;  %2928 = vmatmul.bf16.gmra.mxu1 %v2836_v44 }
 0x6dd   :  { %v2762_v46 = vadd.f32 %v5312_v62, %v2761_v30 }
 0x6df   :  { %v2808_v26 = vmul.f32 0.01, %v2762_v46  ;;  %vm2792_vm7 = vcmp.ge.f32.partialorder %v2762_v46, 0.0 }
 0x6e1   :  { %v2824_v59 = vsel %vm2792_vm7, %v2762_v46, %v2808_v26 }
 0x6e4   :  { %v2763_v5 = vpop.f32.mrf.mxu0 }
 0x6e5   :  { %v2764_v10 = vadd.f32 %v5312_v62, %v2763_v5 }
 0x6e7   :  { %vm2793_vm8 = vcmp.ge.f32.partialorder %v2764_v10, 0.0  ;;  %v2809_v9 = vmul.f32 0.01, %v2764_v10 }
 0x6e9   :  { %v2825_v12 = vsel %vm2793_vm8, %v2764_v10, %v2809_v9 }
 0x6ea   :  { %v2837_v57 = vpack.c.bf16 %v2825_v12, %v2824_v59 }
 0x6ec   :  { %v2766_v3 = vpop.f32.mrf.mxu0  ;;  %2933 = vmatmul.bf16.gmra.mxu1 %v2837_v57 }
 0x6ed   :  { %v2767_v17 = vadd.f32 %v5312_v62, %v2766_v3 }
 0x6ef   :  { %v2810_v4 = vmul.f32 0.01, %v2767_v17  ;;  %vm2794_vm9 = vcmp.ge.f32.partialorder %v2767_v17, 0.0 }
 0x6f1   :  { %v2826_v16 = vsel %vm2794_vm9, %v2767_v17, %v2810_v4 }
 0x6f4   :  { %v2768_v36 = vpop.f32.mrf.mxu0 }
 0x6f5   :  { %v2769_v14 = vadd.f32 %v5312_v62, %v2768_v36 }
 0x6f7   :  { %vm2795_vm10 = vcmp.ge.f32.partialorder %v2769_v14, 0.0  ;;  %v2811_v15 = vmul.f32 0.01, %v2769_v14 }
 0x6f9   :  { %v2827_v49 = vsel %vm2795_vm10, %v2769_v14, %v2811_v15 }
 0x6fa   :  { %v2838_v51 = vpack.c.bf16 %v2827_v49, %v2826_v16 }
 0x6fc   :  { %v2771_v61 = vpop.f32.mrf.mxu0  ;;  %2938 = vmatmul.bf16.gmra.mxu1 %v2838_v51 }
 0x6fd   :  { %v2772_v50 = vadd.f32 %v5312_v62, %v2771_v61 }
 0x6ff   :  { %v2812_v48 = vmul.f32 0.01, %v2772_v50  ;;  %vm2796_vm11 = vcmp.ge.f32.partialorder %v2772_v50, 0.0 }
 0x701   :  { %v2828_v58 = vsel %vm2796_vm11, %v2772_v50, %v2812_v48 }
 0x704   :  { %v2773_v42 = vpop.f32.mrf.mxu0 }
 0x705   :  { %v2774_v29 = vadd.f32 %v5312_v62, %v2773_v42 }
 0x707   :  { %vm2797_vm12 = vcmp.ge.f32.partialorder %v2774_v29, 0.0  ;;  %v2813_v35 = vmul.f32 0.01, %v2774_v29 }
 0x709   :  { %v2829_v0 = vsel %vm2797_vm12, %v2774_v29, %v2813_v35 }
 0x70a   :  { %v2839_v13 = vpack.c.bf16 %v2829_v0, %v2828_v58 }
 0x70c   :  { %v2776_v18 = vpop.f32.mrf.mxu0  ;;  %2943 = vmatmul.bf16.gmra.mxu1 %v2839_v13 }
 0x70d   :  { %v2777_v60 = vadd.f32 %v5312_v62, %v2776_v18 }
 0x70f   :  { %v2814_v21 = vmul.f32 0.01, %v2777_v60  ;;  %vm2798_vm13 = vcmp.ge.f32.partialorder %v2777_v60, 0.0 }
 0x711   :  { %v2830_v8 = vsel %vm2798_vm13, %v2777_v60, %v2814_v21 }
 0x714   :  { %v2778_v20 = vpop.f32.mrf.mxu0 }
 0x715   :  { %v2779_v23 = vadd.f32 %v5312_v62, %v2778_v20 }
 0x717   :  { %vm2799_vm14 = vcmp.ge.f32.partialorder %v2779_v23, 0.0  ;;  %v2815_v25 = vmul.f32 0.01, %v2779_v23 }
 0x719   :  { %v2831_v19 = vsel %vm2799_vm14, %v2779_v23, %v2815_v25 }
 0x71a   :  { %v2840_v6 = vpack.c.bf16 %v2831_v19, %v2830_v8 }
 0x71c   :  { %v2781_v27 = vpop.f32.mrf.mxu0  ;;  %2948 = vmatmul.bf16.gmra.mxu1 %v2840_v6 }
 0x71d   :  { %v2782_v1 = vadd.f32 %v5312_v62, %v2781_v27 }
 0x71f   :  { %v2816_v32 = vmul.f32 0.01, %v2782_v1  ;;  %vm2800_vm15 = vcmp.ge.f32.partialorder %v2782_v1, 0.0 }
 0x721   :  { %v2832_v39 = vsel %vm2800_vm15, %v2782_v1, %v2816_v32 }
 0x724   :  { %v2783_v31 = vpop.f32.mrf.mxu0 }
 0x725   :  { %v2784_v24 = vadd.f32 %v5312_v62, %v2783_v31 }
 0x727   :  { %vm2801_vm0 = vcmp.ge.f32.partialorder %v2784_v24, 0.0  ;;  %v2817_v33 = vmul.f32 0.01, %v2784_v24 }
 0x729   :  { %v2833_v45 = vsel %vm2801_vm0, %v2784_v24, %v2817_v33 }
 0x72a   :  { %v2841_v56 = vpack.c.bf16 %v2833_v45, %v2832_v39 }
 0x72c   :  { %2953 = vmatmul.bf16.gmra.mxu1 %v2841_v56 }
 0x739   :  { %v2919_v22 = vpop.f32.mrf.mxu1 }
 0x73a   :  { %v2920_v2 = vadd.f32 %v4463_v52, %v2919_v22 }
 0x73c   :  { %2959 = vst [vmem:[%s5398_s17] sm:$0xff] %v2920_v2 }
 0x741   :  { %v2921_v34 = vpop.f32.mrf.mxu1 }
 0x742   :  { %v2922_v40 = vadd.f32 %v4463_v52, %v2921_v34 }
 0x744   :  { %2960 = vst [vmem:[%s5398_s17 + $0x8] sm:$0xff] %v2922_v40 }
 0x749   :  { %v2924_v62 = vpop.f32.mrf.mxu1 }
 0x74a   :  { %v2925_v63 = vadd.f32 %v4463_v52, %v2924_v62 }
 0x74c   :  { %2961 = vst [vmem:[%s5398_s17 + $0x10] sm:$0xff] %v2925_v63 }
 0x751   :  { %v2926_v7 = vpop.f32.mrf.mxu1 }
 0x752   :  { %v2927_v47 = vadd.f32 %v4463_v52, %v2926_v7 }
 0x754   :  { %2962 = vst [vmem:[%s5398_s17 + $0x18] sm:$0xff] %v2927_v47 }
 0x759   :  { %v2929_v28 = vpop.f32.mrf.mxu1 }
 0x75a   :  { %v2930_v54 = vadd.f32 %v4463_v52, %v2929_v28 }
 0x75c   :  { %2963 = vst [vmem:[%s5398_s17 + $0x20] sm:$0xff] %v2930_v54 }
 0x761   :  { %v2931_v55 = vpop.f32.mrf.mxu1 }
 0x762   :  { %v2932_v53 = vadd.f32 %v4463_v52, %v2931_v55 }
 0x764   :  { %2964 = vst [vmem:[%s5398_s17 + $0x28] sm:$0xff] %v2932_v53 }
 0x769   :  { %v2934_v37 = vpop.f32.mrf.mxu1 }
 0x76a   :  { %v2935_v38 = vadd.f32 %v4463_v52, %v2934_v37 }
 0x76c   :  { %2965 = vst [vmem:[%s5398_s17 + $0x30] sm:$0xff] %v2935_v38 }
 0x771   :  { %v2936_v41 = vpop.f32.mrf.mxu1 }
 0x772   :  { %v2937_v43 = vadd.f32 %v4463_v52, %v2936_v41 }
 0x774   :  { %2966 = vst [vmem:[%s5398_s17 + $0x38] sm:$0xff] %v2937_v43 }
 0x779   :  { %v2939_v11 = vpop.f32.mrf.mxu1 }
 0x77a   :  { %v2940_v44 = vadd.f32 %v4463_v52, %v2939_v11 }
 0x77c   :  { %2967 = vst [vmem:[%s5398_s17 + $0x40] sm:$0xff] %v2940_v44 }
 0x781   :  { %v2941_v30 = vpop.f32.mrf.mxu1 }
 0x782   :  { %v2942_v46 = vadd.f32 %v4463_v52, %v2941_v30 }
 0x784   :  { %2968 = vst [vmem:[%s5398_s17 + $0x48] sm:$0xff] %v2942_v46 }
 0x789   :  { %v2944_v5 = vpop.f32.mrf.mxu1 }
 0x78a   :  { %v2945_v26 = vadd.f32 %v4463_v52, %v2944_v5 }
 0x78c   :  { %2969 = vst [vmem:[%s5398_s17 + $0x50] sm:$0xff] %v2945_v26 }
 0x791   :  { %v2946_v10 = vpop.f32.mrf.mxu1 }
 0x792   :  { %v2947_v9 = vadd.f32 %v4463_v52, %v2946_v10 }
 0x794   :  { %2970 = vst [vmem:[%s5398_s17 + $0x58] sm:$0xff] %v2947_v9 }
 0x799   :  { %v2949_v59 = vpop.f32.mrf.mxu1 }
 0x79a   :  { %v2950_v12 = vadd.f32 %v4463_v52, %v2949_v59 }
 0x79c   :  { %2971 = vst [vmem:[%s5398_s17 + $0x60] sm:$0xff] %v2950_v12 }
 0x7a1   :  { %v2951_v57 = vpop.f32.mrf.mxu1 }
 0x7a2   :  { %v2952_v3 = vadd.f32 %v4463_v52, %v2951_v57 }
 0x7a4   :  { %2972 = vst [vmem:[%s5398_s17 + $0x68] sm:$0xff] %v2952_v3 }
 0x7a9   :  { %v2954_v17 = vpop.f32.mrf.mxu1 }
 0x7aa   :  { %v2955_v36 = vadd.f32 %v4463_v52, %v2954_v17 }
 0x7ac   :  { %2973 = vst [vmem:[%s5398_s17 + $0x70] sm:$0xff] %v2955_v36 }
 0x7b1   :  { %v2956_v4 = vpop.f32.mrf.mxu1 }
 0x7b2   :  { %v2957_v14 = vadd.f32 %v4463_v52, %v2956_v4 }
 0x7b4   :  { %2974 = vst [vmem:[%s5398_s17 + $0x78] sm:$0xff] %v2957_v14 }

</bundles_post_ra>
